<compile_context>
chip_gen: v7x
topology: tpu7x:2x2x1
jax: 0.10.0
libtpu: 0.0.40
codegen_flags: <defaults>
</compile_context>

<pallas_src>
import functools

import jax
import jax.numpy as jnp
from jax.experimental import pallas as pl
from jax.experimental.pallas import tpu as pltpu


# ----------------------------------------------------------------------------
# true (un-padded) layer sizes from LN_8.__init__
# ----------------------------------------------------------------------------
D_IN = 226
TRUNK_DIMS = [226, 452, 452, 226, 226, 226, 240, 240]   # trunk: 7 x Linear+ReLU
LAST = 240
REG_OUT = 4
CLASS_OUT = 30
HEAD_COLS = REG_OUT + 4 * CLASS_OUT   # 124 packed head columns (reg | 4x class)

D_IN_P = 256     # round_up(226, 128)
LAST_P = 256     # round_up(240, 128)
HEAD_P = 128     # packed head lanes (124 real cols, 4 zero pad)

MAX_TILE = 2048  # batch-tile cap: ~20 MiB VMEM at 2048, safe on v5e/v6e/v7x


def _rup(x, m):
    return ((x + m - 1) // m) * m


def _pad2d(a, rows, cols):
    return jnp.pad(a, ((0, rows - a.shape[0]), (0, cols - a.shape[1])))


def _choose_tile(B, max_tile):
    """Batch tile: multiples of 256 (MXU width on v6e/v7x) for large batches,
    split into >=2 grid steps so both v7x TensorCores get work."""
    max_tile = max(16, (max_tile // 16) * 16)
    if B <= 256:                                  # tiny batch: one small tile
        return min(_rup(B, 16), max_tile)         # 16 = bf16 sublane packing
    tb = _rup((B + 1) // 2, 256)                  # aim for a >=2-step grid
    return min(tb, max_tile)


# ----------------------------------------------------------------------------
# Pallas kernel: 7 x (bf16 matmul -> f32 acc -> f32 ReLU -> bf16), packed head
# ----------------------------------------------------------------------------
def _mlp_kernel(x_ref, w1, w2, w3, w4, w5, w6, w7, wh, o_ref):
    h = x_ref[...]                                # (TB, 256) bf16
    for w_ref in (w1, w2, w3, w4, w5, w6, w7):
        acc = jnp.dot(h, w_ref[...], preferred_element_type=jnp.float32)
        acc = jnp.maximum(acc, 0.0)               # ReLU in f32 (free VALU slot)
        h = acc.astype(jnp.bfloat16)              # bf16 input for next MXU pass
    # one packed, lane-dense head matmul: cols [0:4]=reg, [4:124]=class heads
    o_ref[...] = jnp.dot(h, wh[...], preferred_element_type=jnp.float32)


# ----------------------------------------------------------------------------
# Parameters (PyTorch layout) and one-time weight preparation
# ----------------------------------------------------------------------------
def init_params(key):
    """Deterministic params, PyTorch layout (out_features, in_features)."""
    params = {}
    keys = jax.random.split(key, 12)
    ki = 0
    for li in range(7):
        fin, fout = TRUNK_DIMS[li], TRUNK_DIMS[li + 1]
        params[f"trunk_{li}"] = (
            jax.random.normal(keys[ki], (fout, fin), jnp.float32) * 0.05)
        ki += 1
    params["reg"] = jax.random.normal(keys[ki], (REG_OUT, LAST), jnp.float32) * 0.05
    ki += 1
    for hi in range(4):
        params[f"head_{hi}"] = (
            jax.random.normal(keys[ki], (CLASS_OUT, LAST), jnp.float32) * 0.05)
        ki += 1
    return params


def prepare_weights(params):
    """Run ONCE: (in, out)-layout, zero-padded to (8,128)-aligned tiles, bf16.
    The reg head and all 4 class heads are packed into one 128-lane weight."""
    trunk = []
    for li in range(7):
        fin, fout = TRUNK_DIMS[li], TRUNK_DIMS[li + 1]
        wt = params[f"trunk_{li}"].T.astype(jnp.bfloat16)            # (in, out)
        trunk.append(_pad2d(wt, _rup(fin, 128), _rup(fout, 128)))
    packed = jnp.concatenate(
        [params["reg"].T] + [params[f"head_{i}"].T for i in range(4)],
        axis=1)                                                      # (240, 124)
    head = _pad2d(packed.astype(jnp.bfloat16), LAST_P, HEAD_P)       # (256, 128)
    return {"trunk": tuple(trunk), "head": head}


# ----------------------------------------------------------------------------
# Forward
# ----------------------------------------------------------------------------
@functools.partial(jax.jit, static_argnames=("max_tile",))
def _ln8_packed_forward(prepared, x, max_tile):
    """Returns the packed (B, 128) f32 head output; one kernel for reg+class."""
    B = x.shape[0]
    TB = _choose_tile(B, max_tile)
    Bp = _rup(B, TB)                              # grid divides exactly
    n_steps = Bp // TB

    # bf16 cast + pad stay inside the jit; allow_input_fusion lets XLA fuse
    # this producer into the kernel's input read (no padded HBM copy).
    x_p = _pad2d(x.astype(jnp.bfloat16), Bp, D_IN_P)

    trunk_w = prepared["trunk"]
    head_w = prepared["head"]
    n_inputs = 1 + len(trunk_w) + 1

    def resident(w):                              # full-shape block, never re-DMA'd
        return pl.BlockSpec(w.shape, lambda i: (0, 0))

    out = pl.pallas_call(
        _mlp_kernel,
        out_shape=jax.ShapeDtypeStruct((Bp, HEAD_P), jnp.float32),
        grid=(n_steps,),
        in_specs=(
            [pl.BlockSpec((TB, D_IN_P), lambda i: (i, 0))]
            + [resident(w) for w in trunk_w]
            + [resident(head_w)]
        ),
        out_specs=pl.BlockSpec((TB, HEAD_P), lambda i: (i, 0)),
        compiler_params=pltpu.CompilerParams(
            dimension_semantics=("parallel",),        # v7x: batch over 2 TCs
            vmem_limit_bytes=48 * 1024 * 1024,        # <= v7x 64 MiB/TC budget
            allow_input_fusion=[True] + [False] * (n_inputs - 1),
        ),
    )(x_p, *trunk_w, head_w)
    return out[:B]


def ln8_forward(prepared, x, network_type="class", max_tile=MAX_TILE):
    out = _ln8_packed_forward(prepared, x, max_tile=max_tile)
    if network_type == "reg":
        return out[:, :REG_OUT]
    if network_type == "class":
        return tuple(
            out[:, REG_OUT + i * CLASS_OUT: REG_OUT + (i + 1) * CLASS_OUT]
            for i in range(4))
    raise ValueError(network_type)


# ----------------------------------------------------------------------------
# Pure-JAX reference: mirrors the PyTorch forward structure exactly, with the
# same bf16 input/weight rounding + f32 accumulation the kernel uses, so the
# comparison isolates kernel plumbing (padding, packing, tiling) from dtype.
# ----------------------------------------------------------------------------
def ln8_reference(params, x, network_type):
    h = x.astype(jnp.bfloat16)
    for li in range(7):
        w = params[f"trunk_{li}"].T.astype(jnp.bfloat16)
        h = jnp.maximum(jnp.dot(h, w, preferred_element_type=jnp.float32), 0.0)
        h = h.astype(jnp.bfloat16)
    if network_type == "reg":
        return jnp.dot(h, params["reg"].T.astype(jnp.bfloat16),
                       preferred_element_type=jnp.float32)
    return tuple(
        jnp.dot(h, params[f"head_{i}"].T.astype(jnp.bfloat16),
                preferred_element_type=jnp.float32)
        for i in range(4))


if __name__ == "__main__":
    key = jax.random.PRNGKey(0)
    pkey, k1, k2, k3 = jax.random.split(key, 4)
    params = init_params(pkey)
    prepared = prepare_weights(params)            # one-time padding / bf16 cast

    TOL = dict(atol=1e-2, rtol=1e-2)

    # --- small batch, single grid step ---------------------------------------
    x = jax.random.normal(k1, (8, D_IN), jnp.float32)
    out_class = jax.block_until_ready(ln8_forward(prepared, x, "class"))
    ref_class = ln8_reference(params, x, "class")
    for o, r in zip(out_class, ref_class):
        assert o.shape == (8, CLASS_OUT)
        assert jnp.allclose(o, r, **TOL)

    out_reg = jax.block_until_ready(ln8_forward(prepared, x, "reg"))
    ref_reg = ln8_reference(params, x, "reg")
    assert out_reg.shape == (8, REG_OUT)
    assert jnp.allclose(out_reg, ref_reg, **TOL)

    # --- multi-step batch grid (tile 16 -> grid=(3,), padded last tile) ------
    xb = jax.random.normal(k2, (40, D_IN), jnp.float32)
    ob = jax.block_until_ready(ln8_forward(prepared, xb, "class", max_tile=16))
    rb = ln8_reference(params, xb, "class")
    for o, r in zip(ob, rb):
        assert o.shape == (40, CLASS_OUT)
        assert jnp.allclose(o, r, **TOL)

    # --- default tiling at B>256: TB=256, two grid steps (v7x 2-TC path) -----
    xc = jax.random.normal(k3, (300, D_IN), jnp.float32)
    oc = jax.block_until_ready(ln8_forward(prepared, xc, "reg"))
    rc = ln8_reference(params, xc, "reg")
    assert oc.shape == (300, REG_OUT)
    assert jnp.allclose(oc, rc, **TOL)

    print("KERNEL_OK")
</pallas_src>

<mosaic_0001>
module attributes {stable_mosaic.version = 11 : i64} {
  func.func @_mlp_kernel(%arg0: i32, %arg1: memref<16x256xbf16, #tpu.memory_space<vmem>>, %arg2: memref<256x512xbf16, #tpu.memory_space<vmem>>, %arg3: memref<512x512xbf16, #tpu.memory_space<vmem>>, %arg4: memref<512x256xbf16, #tpu.memory_space<vmem>>, %arg5: memref<256x256xbf16, #tpu.memory_space<vmem>>, %arg6: memref<256x256xbf16, #tpu.memory_space<vmem>>, %arg7: memref<256x256xbf16, #tpu.memory_space<vmem>>, %arg8: memref<256x256xbf16, #tpu.memory_space<vmem>>, %arg9: memref<256x128xbf16, #tpu.memory_space<vmem>>, %arg10: memref<16x128xf32, #tpu.memory_space<vmem>>) attributes {dimension_semantics = [#tpu.dimension_semantics<parallel>], iteration_bounds = array<i64: 1>, scalar_prefetch = 0 : i64, scratch_operands = 0 : i64, tpu.core_type = #tpu.core_type<tc>, window_params = [{transform_indices = @transform_0, window_bounds = array<i64: 16, 256>}, {pipeline_mode = #tpu.pipeline_mode<synchronous>, transform_indices = @transform_1, window_bounds = array<i64: 256, 512>}, {pipeline_mode = #tpu.pipeline_mode<synchronous>, transform_indices = @transform_2, window_bounds = array<i64: 512, 512>}, {pipeline_mode = #tpu.pipeline_mode<synchronous>, transform_indices = @transform_3, window_bounds = array<i64: 512, 256>}, {pipeline_mode = #tpu.pipeline_mode<synchronous>, transform_indices = @transform_4, window_bounds = array<i64: 256, 256>}, {pipeline_mode = #tpu.pipeline_mode<synchronous>, transform_indices = @transform_5, window_bounds = array<i64: 256, 256>}, {pipeline_mode = #tpu.pipeline_mode<synchronous>, transform_indices = @transform_6, window_bounds = array<i64: 256, 256>}, {pipeline_mode = #tpu.pipeline_mode<synchronous>, transform_indices = @transform_7, window_bounds = array<i64: 256, 256>}, {pipeline_mode = #tpu.pipeline_mode<synchronous>, transform_indices = @transform_8, window_bounds = array<i64: 256, 128>}, {transform_indices = @transform_9, window_bounds = array<i64: 16, 128>}]} {
    %c0 = arith.constant 0 : index
    %c0_0 = arith.constant 0 : index
    %0 = vector.load %arg1[%c0, %c0_0] : memref<16x256xbf16, #tpu.memory_space<vmem>>, vector<16x256xbf16>
    %c0_1 = arith.constant 0 : index
    %c0_2 = arith.constant 0 : index
    %1 = vector.load %arg2[%c0_1, %c0_2] : memref<256x512xbf16, #tpu.memory_space<vmem>>, vector<256x512xbf16>
    %cst = arith.constant dense<0.000000e+00> : vector<16x512xf32>
    %2 = tpu.matmul %0, %1, %cst {dimension_numbers = #tpu.dot_dimension_numbers<[1], [0], [0], [1], [0, 0, 1, 1], [], []>} : vector<16x256xbf16>, vector<256x512xbf16>, vector<16x512xf32> -> vector<16x512xf32>
    %cst_3 = arith.constant 0.000000e+00 : f32
    %3 = vector.broadcast %cst_3 : f32 to vector<16x512xf32>
    %4 = arith.maximumf %2, %3 : vector<16x512xf32>
    %5 = arith.truncf %4 : vector<16x512xf32> to vector<16x512xbf16>
    %c0_4 = arith.constant 0 : index
    %c0_5 = arith.constant 0 : index
    %6 = vector.load %arg3[%c0_4, %c0_5] : memref<512x512xbf16, #tpu.memory_space<vmem>>, vector<512x512xbf16>
    %cst_6 = arith.constant dense<0.000000e+00> : vector<16x512xf32>
    %7 = tpu.matmul %5, %6, %cst_6 {dimension_numbers = #tpu.dot_dimension_numbers<[1], [0], [0], [1], [0, 0, 1, 1], [], []>} : vector<16x512xbf16>, vector<512x512xbf16>, vector<16x512xf32> -> vector<16x512xf32>
    %cst_7 = arith.constant 0.000000e+00 : f32
    %8 = vector.broadcast %cst_7 : f32 to vector<16x512xf32>
    %9 = arith.maximumf %7, %8 : vector<16x512xf32>
    %10 = arith.truncf %9 : vector<16x512xf32> to vector<16x512xbf16>
    %c0_8 = arith.constant 0 : index
    %c0_9 = arith.constant 0 : index
    %11 = vector.load %arg4[%c0_8, %c0_9] : memref<512x256xbf16, #tpu.memory_space<vmem>>, vector<512x256xbf16>
    %cst_10 = arith.constant dense<0.000000e+00> : vector<16x256xf32>
    %12 = tpu.matmul %10, %11, %cst_10 {dimension_numbers = #tpu.dot_dimension_numbers<[1], [0], [0], [1], [0, 0, 1, 1], [], []>} : vector<16x512xbf16>, vector<512x256xbf16>, vector<16x256xf32> -> vector<16x256xf32>
    %cst_11 = arith.constant 0.000000e+00 : f32
    %13 = vector.broadcast %cst_11 : f32 to vector<16x256xf32>
    %14 = arith.maximumf %12, %13 : vector<16x256xf32>
    %15 = arith.truncf %14 : vector<16x256xf32> to vector<16x256xbf16>
    %c0_12 = arith.constant 0 : index
    %c0_13 = arith.constant 0 : index
    %16 = vector.load %arg5[%c0_12, %c0_13] : memref<256x256xbf16, #tpu.memory_space<vmem>>, vector<256x256xbf16>
    %cst_14 = arith.constant dense<0.000000e+00> : vector<16x256xf32>
    %17 = tpu.matmul %15, %16, %cst_14 {dimension_numbers = #tpu.dot_dimension_numbers<[1], [0], [0], [1], [0, 0, 1, 1], [], []>} : vector<16x256xbf16>, vector<256x256xbf16>, vector<16x256xf32> -> vector<16x256xf32>
    %cst_15 = arith.constant 0.000000e+00 : f32
    %18 = vector.broadcast %cst_15 : f32 to vector<16x256xf32>
    %19 = arith.maximumf %17, %18 : vector<16x256xf32>
    %20 = arith.truncf %19 : vector<16x256xf32> to vector<16x256xbf16>
    %c0_16 = arith.constant 0 : index
    %c0_17 = arith.constant 0 : index
    %21 = vector.load %arg6[%c0_16, %c0_17] : memref<256x256xbf16, #tpu.memory_space<vmem>>, vector<256x256xbf16>
    %cst_18 = arith.constant dense<0.000000e+00> : vector<16x256xf32>
    %22 = tpu.matmul %20, %21, %cst_18 {dimension_numbers = #tpu.dot_dimension_numbers<[1], [0], [0], [1], [0, 0, 1, 1], [], []>} : vector<16x256xbf16>, vector<256x256xbf16>, vector<16x256xf32> -> vector<16x256xf32>
    %cst_19 = arith.constant 0.000000e+00 : f32
    %23 = vector.broadcast %cst_19 : f32 to vector<16x256xf32>
    %24 = arith.maximumf %22, %23 : vector<16x256xf32>
    %25 = arith.truncf %24 : vector<16x256xf32> to vector<16x256xbf16>
    %c0_20 = arith.constant 0 : index
    %c0_21 = arith.constant 0 : index
    %26 = vector.load %arg7[%c0_20, %c0_21] : memref<256x256xbf16, #tpu.memory_space<vmem>>, vector<256x256xbf16>
    %cst_22 = arith.constant dense<0.000000e+00> : vector<16x256xf32>
    %27 = tpu.matmul %25, %26, %cst_22 {dimension_numbers = #tpu.dot_dimension_numbers<[1], [0], [0], [1], [0, 0, 1, 1], [], []>} : vector<16x256xbf16>, vector<256x256xbf16>, vector<16x256xf32> -> vector<16x256xf32>
    %cst_23 = arith.constant 0.000000e+00 : f32
    %28 = vector.broadcast %cst_23 : f32 to vector<16x256xf32>
    %29 = arith.maximumf %27, %28 : vector<16x256xf32>
    %30 = arith.truncf %29 : vector<16x256xf32> to vector<16x256xbf16>
    %c0_24 = arith.constant 0 : index
    %c0_25 = arith.constant 0 : index
    %31 = vector.load %arg8[%c0_24, %c0_25] : memref<256x256xbf16, #tpu.memory_space<vmem>>, vector<256x256xbf16>
    %cst_26 = arith.constant dense<0.000000e+00> : vector<16x256xf32>
    %32 = tpu.matmul %30, %31, %cst_26 {dimension_numbers = #tpu.dot_dimension_numbers<[1], [0], [0], [1], [0, 0, 1, 1], [], []>} : vector<16x256xbf16>, vector<256x256xbf16>, vector<16x256xf32> -> vector<16x256xf32>
    %cst_27 = arith.constant 0.000000e+00 : f32
    %33 = vector.broadcast %cst_27 : f32 to vector<16x256xf32>
    %34 = arith.maximumf %32, %33 : vector<16x256xf32>
    %35 = arith.truncf %34 : vector<16x256xf32> to vector<16x256xbf16>
    %c0_28 = arith.constant 0 : index
    %c0_29 = arith.constant 0 : index
    %36 = vector.load %arg9[%c0_28, %c0_29] : memref<256x128xbf16, #tpu.memory_space<vmem>>, vector<256x128xbf16>
    %cst_30 = arith.constant dense<0.000000e+00> : vector<16x128xf32>
    %37 = tpu.matmul %35, %36, %cst_30 {dimension_numbers = #tpu.dot_dimension_numbers<[1], [0], [0], [1], [0, 0, 1, 1], [], []>} : vector<16x256xbf16>, vector<256x128xbf16>, vector<16x128xf32> -> vector<16x128xf32>
    %c0_31 = arith.constant 0 : index
    %c0_32 = arith.constant 0 : index
    %38 = vector.load %arg10[%c0_31, %c0_32] : memref<16x128xf32, #tpu.memory_space<vmem>>, vector<16x128xf32>
    tpu.vector_store %arg10[%c0_31, %c0_32], %37 {strides = array<i32>} : memref<16x128xf32, #tpu.memory_space<vmem>>, vector<16x128xf32>,
    return
  }
  func.func @transform_0(%arg0: i32) -> (i32, i32) {
    %c0_i32 = arith.constant 0 : i32
    %c0_i32_0 = arith.constant 0 : i32
    return %arg0, %c0_i32 : i32, i32
  }
  func.func @transform_1(%arg0: i32) -> (i32, i32) {
    %c0_i32 = arith.constant 0 : i32
    %c0_i32_0 = arith.constant 0 : i32
    %c0_i32_1 = arith.constant 0 : i32
    return %c0_i32, %c0_i32_0 : i32, i32
  }
  func.func @transform_2(%arg0: i32) -> (i32, i32) {
    %c0_i32 = arith.constant 0 : i32
    %c0_i32_0 = arith.constant 0 : i32
    %c0_i32_1 = arith.constant 0 : i32
    return %c0_i32, %c0_i32_0 : i32, i32
  }
  func.func @transform_3(%arg0: i32) -> (i32, i32) {
    %c0_i32 = arith.constant 0 : i32
    %c0_i32_0 = arith.constant 0 : i32
    %c0_i32_1 = arith.constant 0 : i32
    return %c0_i32, %c0_i32_0 : i32, i32
  }
  func.func @transform_4(%arg0: i32) -> (i32, i32) {
    %c0_i32 = arith.constant 0 : i32
    %c0_i32_0 = arith.constant 0 : i32
    %c0_i32_1 = arith.constant 0 : i32
    return %c0_i32, %c0_i32_0 : i32, i32
  }
  func.func @transform_5(%arg0: i32) -> (i32, i32) {
    %c0_i32 = arith.constant 0 : i32
    %c0_i32_0 = arith.constant 0 : i32
    %c0_i32_1 = arith.constant 0 : i32
    return %c0_i32, %c0_i32_0 : i32, i32
  }
  func.func @transform_6(%arg0: i32) -> (i32, i32) {
    %c0_i32 = arith.constant 0 : i32
    %c0_i32_0 = arith.constant 0 : i32
    %c0_i32_1 = arith.constant 0 : i32
    return %c0_i32, %c0_i32_0 : i32, i32
  }
  func.func @transform_7(%arg0: i32) -> (i32, i32) {
    %c0_i32 = arith.constant 0 : i32
    %c0_i32_0 = arith.constant 0 : i32
    %c0_i32_1 = arith.constant 0 : i32
    return %c0_i32, %c0_i32_0 : i32, i32
  }
  func.func @transform_8(%arg0: i32) -> (i32, i32) {
    %c0_i32 = arith.constant 0 : i32
    %c0_i32_0 = arith.constant 0 : i32
    %c0_i32_1 = arith.constant 0 : i32
    return %c0_i32, %c0_i32_0 : i32, i32
  }
  func.func @transform_9(%arg0: i32) -> (i32, i32) {
    %c0_i32 = arith.constant 0 : i32
    %c0_i32_0 = arith.constant 0 : i32
    return %arg0, %c0_i32 : i32, i32
  }
}

</mosaic_0001>

<bundles_post_ra>
// kernel: _ln8_packed_forward.2
= control target key start
LH: loop header
LB: loop body
LE: loop exit
PB: predicated region body
PF: predicated region fallthrough
CT: control target
= control target key end

     0   :  { %s4717_s0 = inlined_call_operand.hbm [shape: bf16[256,512], index: 0, kind: input, shape index: {}]   ;;  %s4718_s1 = inlined_call_operand.hbm [shape: bf16[512,512], index: 1, kind: input, shape index: {}]   ;;  %s4719_s2 = inlined_call_operand.hbm [shape: bf16[512,256], index: 2, kind: input, shape index: {}]   ;;  %s4720_s3 = inlined_call_operand.hbm [shape: bf16[256,256], index: 3, kind: input, shape index: {}]   ;;  %s4721_s4 = inlined_call_operand.hbm [shape: bf16[256,256], index: 4, kind: input, shape index: {}]   ;;  %s4722_s5 = inlined_call_operand.hbm [shape: bf16[256,256], index: 5, kind: input, shape index: {}]   ;;  %s4723_s6 = inlined_call_operand.hbm [shape: bf16[256,256], index: 6, kind: input, shape index: {}]   ;;  %s4724_s7 = inlined_call_operand.hbm [shape: bf16[256,128], index: 7, kind: input, shape index: {}]   ;;  %s4725_s8 = inlined_call_operand.vmem [shape: bf16[8,226], index: 8, kind: input, shape index: {}]   ;;  %s4726_s9 = inlined_call_operand.<no memory space> [shape: bf16[], index: 9, kind: input, shape index: {}]   ;;  %s4727_s10 = inlined_call_operand.vmem [shape: f32[16,128], index: 10, kind: output, shape index: {}]  }
   0x1   :  { %v15_v0 = vstv %s4726_s9 }
   0x2   :  { %v4572_v1 = vunpack.i.l.bf16 %v15_v0 }
   0x3   :  { %20 = vsyncpa [#allocation8], 0 }
   0x4   :  { %21 = vsyncpa [#allocation10], 0 }
   0x5   :  { %22 = vsyncpa [#allocation13], 0 }
   0x6   :  { %23 = vsyncpa [#allocation16], 0 }
   0x7   :  { %24 = vsyncpa [#allocation19], 0  ;;  %s4499_s15 = smov [#allocation9]   ;;  %s4313_s19 = scalar_lea.hbm %s4718_s1, 16384 }
   0x8   :  { %s44_s16 = sshll.u32 %s4499_s15, 4  ;;  %p4314_p0 = scmp.ne.s32.totalorder %s4718_s1, %s4313_s19  ;;  %s45_s16 = int_to_ptr.vmem [resolvable:$true] %s44_s16 }
   0x9   :  { %p4317_p1 = scmp.lt.u32.totalorder %s4313_s19, %s4718_s1 }
   0xb   :  { %p4319_p2 = pnand %p4317_p1, %p4314_p0 }
   0xd   :  { %4322 = shalt.err (!%p4319_p2)
}
   0xe   :  { %s4323_s23 = scalar_lea.vmem %s45_s16, 16384  ;;  %p4328_p4 = scmp.lt.s32.totalorder %s45_s16, %s45_s16 }
   0xf   :  { %p4324_p3 = scmp.ne.s32.totalorder %s45_s16, %s4323_s23  ;;  %p4329_p5 = scmp.lt.s32.totalorder %s4323_s23, %s4323_s23 }
  0x11   :  { %p4330_p6 = por %p4329_p5, %p4328_p4 }
  0x13   :  { %p4331_p7 = pnand %p4330_p6, %p4324_p3 }
  0x15   :  { %4334 = shalt.err (!%p4331_p7)
}
  0x16   :  { %s4500_s24 = smov 256   ;;  %s4501_s25 = smov 16  }
  0x17   :  { %50 = dma.hbm_to_vmem [thread:$0]  %s4718_s1, 16384, %s45_s16, [#allocation10], %s4500_s24, %s4500_s24, %s4501_s25  }
  0x18   :  { %s4502_s28 = smov [#allocation12]   ;;  %s4503_s30 = smov [#allocation15]  }
  0x19   :  { %s68_s29 = sshll.u32 %s4502_s28, 4  ;;  %s92_s11 = sshll.u32 %s4503_s30, 4  ;;  %s69_s29 = int_to_ptr.vmem [resolvable:$true] %s68_s29  ;;  %s93_s11 = int_to_ptr.vmem [resolvable:$true] %s92_s11 }
  0x1a   :  { %s4335_s14 = scalar_lea.hbm %s4720_s3, 4096 }
  0x1b   :  { %p4336_p8 = scmp.ne.s32.totalorder %s4720_s3, %s4335_s14  ;;  %p4339_p9 = scmp.lt.u32.totalorder %s4335_s14, %s4720_s3 }
  0x1d   :  { %p4341_p10 = pnand %p4339_p9, %p4336_p8 }
  0x1f   :  { %4344 = shalt.err (!%p4341_p10)
}
  0x20   :  { %s4345_s1 = scalar_lea.vmem %s69_s29, 4096  ;;  %p4350_p12 = scmp.lt.s32.totalorder %s69_s29, %s69_s29 }
  0x21   :  { %p4346_p11 = scmp.ne.s32.totalorder %s69_s29, %s4345_s1  ;;  %p4351_p13 = scmp.lt.s32.totalorder %s4345_s1, %s4345_s1 }
  0x23   :  { %p4352_p0 = por %p4351_p13, %p4350_p12 }
  0x25   :  { %p4353_p1 = pnand %p4352_p0, %p4346_p11 }
  0x27   :  { %4356 = shalt.err (!%p4353_p1)
}
  0x28   :  { %s4504_s16 = smov 128   ;;  %s4505_s20 = smov 8  }
  0x29   :  { %74 = dma.hbm_to_vmem [thread:$0]  %s4720_s3, 4096, %s69_s29, [#allocation13], %s4504_s16, %s4504_s16, %s4505_s20  }
  0x2a   :  { %s4357_s26 = scalar_lea.hbm %s4722_s5, 4096 }
  0x2b   :  { %p4358_p2 = scmp.ne.s32.totalorder %s4722_s5, %s4357_s26  ;;  %p4361_p3 = scmp.lt.u32.totalorder %s4357_s26, %s4722_s5 }
  0x2d   :  { %p4363_p4 = pnand %p4361_p3, %p4358_p2 }
  0x2f   :  { %4366 = shalt.err (!%p4363_p4)
}
  0x30   :  { %s4367_s13 = scalar_lea.vmem %s93_s11, 4096  ;;  %p4372_p6 = scmp.lt.s32.totalorder %s93_s11, %s93_s11 }
  0x31   :  { %p4368_p5 = scmp.ne.s32.totalorder %s93_s11, %s4367_s13  ;;  %p4373_p7 = scmp.lt.s32.totalorder %s4367_s13, %s4367_s13 }
  0x33   :  { %p4374_p8 = por %p4373_p7, %p4372_p6 }
  0x35   :  { %p4375_p9 = pnand %p4374_p8, %p4368_p5 }
  0x37   :  { %4378 = shalt.err (!%p4375_p9)
}
  0x38   :  { %98 = dma.hbm_to_vmem [thread:$0]  %s4722_s5, 4096, %s93_s11, [#allocation16], %s4504_s16, %s4504_s16, %s4505_s20  }
  0x39   :  { %s4506_s14 = smov [#allocation7]   ;;  %s4507_s17 = smov [#allocation11]  }
  0x3a   :  { %s32_s15 = sshll.u32 %s4506_s14, 4  ;;  %s56_s18 = sshll.u32 %s4507_s17, 4  ;;  %s33_s15 = int_to_ptr.vmem [resolvable:$true] %s32_s15  ;;  %s57_s18 = int_to_ptr.vmem [resolvable:$true] %s56_s18 }
  0x3b   :  { %s4379_s21 = scalar_lea.hbm %s4717_s0, 8192 }
  0x3c   :  { %p4380_p10 = scmp.ne.s32.totalorder %s4717_s0, %s4379_s21  ;;  %p4383_p11 = scmp.lt.u32.totalorder %s4379_s21, %s4717_s0 }
  0x3e   :  { %p4385_p12 = pnand %p4383_p11, %p4380_p10 }
  0x40   :  { %4388 = shalt.err (!%p4385_p12)
}
  0x41   :  { %s4389_s5 = scalar_lea.vmem %s33_s15, 8192  ;;  %p4394_p0 = scmp.lt.s32.totalorder %s33_s15, %s33_s15 }
  0x42   :  { %p4390_p13 = scmp.ne.s32.totalorder %s33_s15, %s4389_s5  ;;  %p4395_p1 = scmp.lt.s32.totalorder %s4389_s5, %s4389_s5 }
  0x44   :  { %p4396_p2 = por %p4395_p1, %p4394_p0 }
  0x46   :  { %p4397_p3 = pnand %p4396_p2, %p4390_p13 }
  0x48   :  { %4400 = shalt.err (!%p4397_p3)
}
  0x49   :  { %38 = dma.hbm_to_vmem [thread:$0]  %s4717_s0, 8192, %s33_s15, [#allocation8], %s4500_s24, %s4500_s24, %s4501_s25  }
  0x4a   :  { %s4401_s12 = scalar_lea.hbm %s4719_s2, 8192 }
  0x4b   :  { %p4402_p4 = scmp.ne.s32.totalorder %s4719_s2, %s4401_s12  ;;  %p4405_p5 = scmp.lt.u32.totalorder %s4401_s12, %s4719_s2 }
  0x4d   :  { %p4407_p6 = pnand %p4405_p5, %p4402_p4 }
  0x4f   :  { %4410 = shalt.err (!%p4407_p6)
}
  0x50   :  { %s4411_s17 = scalar_lea.vmem %s57_s18, 8192  ;;  %p4416_p8 = scmp.lt.s32.totalorder %s57_s18, %s57_s18 }
  0x51   :  { %p4412_p7 = scmp.ne.s32.totalorder %s57_s18, %s4411_s17  ;;  %p4417_p9 = scmp.lt.s32.totalorder %s4411_s17, %s4411_s17 }
  0x53   :  { %p4418_p10 = por %p4417_p9, %p4416_p8 }
  0x55   :  { %p4419_p11 = pnand %p4418_p10, %p4412_p7 }
  0x57   :  { %4422 = shalt.err (!%p4419_p11)
}
  0x58   :  { %62 = dma.hbm_to_vmem [thread:$0]  %s4719_s2, 8192, %s57_s18, [#allocation10], %s4504_s16, %s4504_s16, %s4505_s20  }
  0x59   :  { %s4508_s25 = smov [#allocation14]   ;;  %s4509_s19 = smov [#allocation17]  }
  0x5a   :  { %s80_s15 = sshll.u32 %s4508_s25, 4  ;;  %s104_s1 = sshll.u32 %s4509_s19, 4  ;;  %s81_s15 = int_to_ptr.vmem [resolvable:$true] %s80_s15  ;;  %s105_s1 = int_to_ptr.vmem [resolvable:$true] %s104_s1 }
  0x5b   :  { %s4423_s9 = scalar_lea.hbm %s4721_s4, 4096 }
  0x5c   :  { %p4424_p12 = scmp.ne.s32.totalorder %s4721_s4, %s4423_s9  ;;  %p4427_p13 = scmp.lt.u32.totalorder %s4423_s9, %s4721_s4 }
  0x5e   :  { %p4429_p0 = pnand %p4427_p13, %p4424_p12 }
  0x60   :  { %4432 = shalt.err (!%p4429_p0)
}
  0x61   :  { %s4433_s2 = scalar_lea.vmem %s81_s15, 4096  ;;  %p4438_p2 = scmp.lt.s32.totalorder %s81_s15, %s81_s15 }
  0x62   :  { %p4434_p1 = scmp.ne.s32.totalorder %s81_s15, %s4433_s2  ;;  %p4439_p3 = scmp.lt.s32.totalorder %s4433_s2, %s4433_s2 }
  0x64   :  { %p4440_p4 = por %p4439_p3, %p4438_p2 }
  0x66   :  { %p4441_p5 = pnand %p4440_p4, %p4434_p1 }
  0x68   :  { %4444 = shalt.err (!%p4441_p5)
}
  0x69   :  { %86 = dma.hbm_to_vmem [thread:$0]  %s4721_s4, 4096, %s81_s15, [#allocation13], %s4504_s16, %s4504_s16, %s4505_s20  }
  0x6a   :  { %s4445_s12 = scalar_lea.hbm %s4723_s6, 4096 }
  0x6b   :  { %p4446_p6 = scmp.ne.s32.totalorder %s4723_s6, %s4445_s12  ;;  %p4449_p7 = scmp.lt.u32.totalorder %s4445_s12, %s4723_s6 }
  0x6d   :  { %p4451_p8 = pnand %p4449_p7, %p4446_p6 }
  0x6f   :  { %4454 = shalt.err (!%p4451_p8)
}
  0x70   :  { %s4455_s17 = scalar_lea.vmem %s105_s1, 4096  ;;  %p4460_p10 = scmp.lt.s32.totalorder %s105_s1, %s105_s1 }
  0x71   :  { %p4456_p9 = scmp.ne.s32.totalorder %s105_s1, %s4455_s17  ;;  %p4461_p11 = scmp.lt.s32.totalorder %s4455_s17, %s4455_s17 }
  0x73   :  { %p4462_p12 = por %p4461_p11, %p4460_p10 }
  0x75   :  { %p4463_p13 = pnand %p4462_p12, %p4456_p9 }
  0x77   :  { %4466 = shalt.err (!%p4463_p13)
}
  0x78   :  { %110 = dma.hbm_to_vmem [thread:$0]  %s4723_s6, 4096, %s105_s1, [#allocation16], %s4504_s16, %s4504_s16, %s4505_s20  }
  0x79   :  { %s4510_s24 = smov [#allocation18]   ;;  %s4467_s21 = scalar_lea.hbm %s4724_s7, 2048 }
  0x7a   :  { %s116_s25 = sshll.u32 %s4510_s24, 4  ;;  %p4468_p0 = scmp.ne.s32.totalorder %s4724_s7, %s4467_s21  ;;  %s117_s25 = int_to_ptr.vmem [resolvable:$true] %s116_s25 }
  0x7b   :  { %p4471_p1 = scmp.lt.u32.totalorder %s4467_s21, %s4724_s7 }
  0x7d   :  { %p4473_p2 = pnand %p4471_p1, %p4468_p0 }
  0x7f   :  { %4476 = shalt.err (!%p4473_p2)
}
  0x80   :  { %s4477_s5 = scalar_lea.vmem %s117_s25, 2048  ;;  %p4482_p4 = scmp.lt.s32.totalorder %s117_s25, %s117_s25 }
  0x81   :  { %p4478_p3 = scmp.ne.s32.totalorder %s117_s25, %s4477_s5  ;;  %p4483_p5 = scmp.lt.s32.totalorder %s4477_s5, %s4477_s5 }
  0x83   :  { %p4484_p6 = por %p4483_p5, %p4482_p4 }
  0x85   :  { %p4485_p7 = pnand %p4484_p6, %p4478_p3 }
  0x87   :  { %4488 = shalt.err (!%p4485_p7)
}
  0x88   :  { %s4511_s6 = smov 64   ;;  %s4512_s16 = smov 4  }
  0x89   :  { %122 = dma.hbm_to_vmem [thread:$0]  %s4724_s7, 2048, %s117_s25, [#allocation19], %s4511_s6, %s4511_s6, %s4512_s16  }
  0x8a   :  { %4489 = dma.done.wait [#allocation8], 8192  }
  0x8b   :  { %4490 = vsyncadd [#allocation8], 4294959104 }
  0x8c   :  { %4491 = dma.done.wait [#allocation10], 24576  }
  0x8d   :  { %4492 = vsyncadd [#allocation10], 4294942720 }
  0x8e   :  { %4493 = dma.done.wait [#allocation13], 8192  }
  0x8f   :  { %4494 = vsyncadd [#allocation13], 4294959104 }
  0x90   :  { %4495 = dma.done.wait [#allocation16], 8192  }
  0x91   :  { %4496 = vsyncadd [#allocation16], 4294959104 }
  0x92   :  { %4497 = dma.done.wait [#allocation19], 2048  }
  0x93   :  { %4498 = vsyncadd [#allocation19], 4294965248  ;;  %v4693_v2 = vpack.c.bf16 %v4572_v1, %v4572_v1  ;;  %v3721_v3 = vld [vmem:[#allocation7 + $0x4] ss:$16 sps:$4 sm:$0xff]   ;;  %v3723_v4 = vld [vmem:[#allocation7] ss:$16 sps:$4 sm:$0xff]   ;;  %v180_v11 = vlaneseq }
  0x94   :  { %594 = vmatprep.subr.bf16.mxu0 %v3721_v3  ;;  %v3724_v5 = vld [vmem:[#allocation7 + $0x24] ss:$16 sps:$4 sm:$0xff]   ;;  %v3726_v6 = vld [vmem:[#allocation7 + $0x20] ss:$16 sps:$4 sm:$0xff]   ;;  %v3768_v20 = vld [vmem:[#allocation7 + $0xc] ss:$16 sps:$4 sm:$0xff]  }
  0x95   :  { %595 = vmatpush1.bf16.msra.mxu0 %v3723_v4  ;;  %v3727_v7 = vld [vmem:[#allocation7 + $0x44] ss:$16 sps:$4 sm:$0xff]   ;;  %v3729_v8 = vld [vmem:[#allocation7 + $0x40] ss:$16 sps:$4 sm:$0xff]   ;;  %v181_v14 = vand.u32 127, %v180_v11  ;;  %637 = vmatprep.subr.bf16.mxu1 %v3768_v20  ;;  %v4513_v31 = vmov 0.0  }
  0x96   :  { %596 = vmatprep.subr.bf16.mxu0 %v3724_v5  ;;  %v3730_v9 = vld [vmem:[#allocation7 + $0x64] ss:$16 sps:$4 sm:$0xff]   ;;  %v3732_v10 = vld [vmem:[#allocation7 + $0x60] ss:$16 sps:$4 sm:$0xff]   ;;  %v3771_v22 = vld [vmem:[#allocation7 + $0x8] ss:$16 sps:$4 sm:$0xff]  }
  0x97   :  { %v3733_v12 = vld [vmem:[#allocation7 + $0x84] ss:$16 sps:$4 sm:$0xff]   ;;  %v3735_v13 = vld [vmem:[#allocation7 + $0x80] ss:$16 sps:$4 sm:$0xff]   ;;  %v182_v17 = vadd.s32 128, %v181_v14  ;;  %638 = vmatpush1.bf16.msra.mxu1 %v3771_v22 }
  0x98   :  { %v3736_v15 = vld [vmem:[#allocation7 + $0xa4] ss:$16 sps:$4 sm:$0xff]   ;;  %v3738_v16 = vld [vmem:[#allocation7 + $0xa0] ss:$16 sps:$4 sm:$0xff]   ;;  %v3772_v26 = vld [vmem:[#allocation7 + $0x2c] ss:$16 sps:$4 sm:$0xff]  }
  0x99   :  { %597 = vmatpush1.bf16.msra.mxu0 %v3726_v6  ;;  %v3739_v18 = vld [vmem:[#allocation7 + $0xc4] ss:$16 sps:$4 sm:$0xff]   ;;  %v3741_v19 = vld [vmem:[#allocation7 + $0xc0] ss:$16 sps:$4 sm:$0xff]   ;;  %vm183_vm0 = vcmp.lt.s32.totalorder %v182_v17, 226  ;;  %639 = vmatprep.subr.bf16.mxu1 %v3772_v26 }
  0x9a   :  { %598 = vmatprep.subr.bf16.mxu0 %v3727_v7  ;;  %v3742_v21 = vld [vmem:[#allocation7 + $0xe4] ss:$16 sps:$4 sm:$0xff]   ;;  %v156_v23 = vld [vmem:[%s4725_s8] sm:$0xf]  ;;  %v3774_v27 = vld [vmem:[#allocation7 + $0x28] ss:$16 sps:$4 sm:$0xff]  }
  0x9b   :  { %166 = vst [vmem:[#allocation20] sm:$0xf] %v156_v23  ;;  %v3264_v24 = vld [vmem:[%s4725_s8 + $0x4] sm:$0xf]  ;;  %v3775_v28 = vld [vmem:[#allocation7 + $0x4c] ss:$16 sps:$4 sm:$0xff]   ;;  %640 = vmatpush1.bf16.msra.mxu1 %v3774_v27 }
  0x9c   :  { %v178_v25 = vunpack.c.l.bf16 %v3264_v24  ;;  %v3744_v30 = vld [vmem:[#allocation7 + $0xe0] ss:$16 sps:$4 sm:$0xff]   ;;  %v3745_v33 = vld [vmem:[#allocation7 + $0x104] ss:$16 sps:$4 sm:$0xff]   ;;  %v3777_v34 = vld [vmem:[#allocation7 + $0x48] ss:$16 sps:$4 sm:$0xff]   ;;  %641 = vmatprep.subr.bf16.mxu1 %v3775_v28 }
  0x9d   :  { %599 = vmatpush1.bf16.msra.mxu0 %v3729_v8  ;;  %v3778_v35 = vld [vmem:[#allocation7 + $0x6c] ss:$16 sps:$4 sm:$0xff]   ;;  %v3747_v36 = vld [vmem:[#allocation7 + $0x100] ss:$16 sps:$4 sm:$0xff]   ;;  %v3748_v37 = vld [vmem:[#allocation7 + $0x124] ss:$16 sps:$4 sm:$0xff]  }
  0x9e   :  { %600 = vmatprep.subr.bf16.mxu0 %v3730_v9  ;;  %v184_v29 = vsel %vm183_vm0, %v178_v25, %v4572_v1  ;;  %v3780_v38 = vld [vmem:[#allocation7 + $0x68] ss:$16 sps:$4 sm:$0xff]   ;;  %v3781_v39 = vld [vmem:[#allocation7 + $0x8c] ss:$16 sps:$4 sm:$0xff]   ;;  %v3750_v40 = vld [vmem:[#allocation7 + $0x120] ss:$16 sps:$4 sm:$0xff]  }
  0x9f   :  { %v186_v32 = vpack.c.bf16 %v4513_v31, %v184_v29  ;;  %642 = vmatpush1.bf16.msra.mxu1 %v3777_v34  ;;  %v3751_v41 = vld [vmem:[#allocation7 + $0x144] ss:$16 sps:$4 sm:$0xff]   ;;  %v3783_v43 = vld [vmem:[#allocation7 + $0x88] ss:$16 sps:$4 sm:$0xff]   ;;  %v3784_v45 = vld [vmem:[#allocation7 + $0xac] ss:$16 sps:$4 sm:$0xff]  }
  0xa0   :  { %643 = vmatprep.subr.bf16.mxu1 %v3778_v35  ;;  %v3753_v46 = vld [vmem:[#allocation7 + $0x140] ss:$16 sps:$4 sm:$0xff]   ;;  %v3754_v47 = vld [vmem:[#allocation7 + $0x164] ss:$16 sps:$4 sm:$0xff]   ;;  %v3786_v48 = vld [vmem:[#allocation7 + $0xa8] ss:$16 sps:$4 sm:$0xff]  }
  0xa1   :  { %601 = vmatpush1.bf16.msra.mxu0 %v3732_v10  ;;  %188 = vst [vmem:[#allocation20 + $0x4] sm:$0xf] %v186_v32  ;;  %v3787_v49 = vld [vmem:[#allocation7 + $0xcc] ss:$16 sps:$4 sm:$0xff]   ;;  %v3756_v50 = vld [vmem:[#allocation7 + $0x160] ss:$16 sps:$4 sm:$0xff]  }
  0xa2   :  { %602 = vmatprep.subr.bf16.mxu0 %v3733_v12  ;;  %v3757_v51 = vld [vmem:[#allocation7 + $0x184] ss:$16 sps:$4 sm:$0xff]   ;;  %v3789_v52 = vld [vmem:[#allocation7 + $0xc8] ss:$16 sps:$4 sm:$0xff]   ;;  %v3790_v53 = vld [vmem:[#allocation7 + $0xec] ss:$16 sps:$4 sm:$0xff]  }
  0xa3   :  { %644 = vmatpush1.bf16.msra.mxu1 %v3780_v38  ;;  %v3759_v54 = vld [vmem:[#allocation7 + $0x180] ss:$16 sps:$4 sm:$0xff]   ;;  %v3760_v55 = vld [vmem:[#allocation7 + $0x1a4] ss:$16 sps:$4 sm:$0xff]   ;;  %v3792_v56 = vld [vmem:[#allocation7 + $0xe8] ss:$16 sps:$4 sm:$0xff]  }
  0xa4   :  { %645 = vmatprep.subr.bf16.mxu1 %v3781_v39  ;;  %v3793_v57 = vld [vmem:[#allocation7 + $0x10c] ss:$16 sps:$4 sm:$0xff]   ;;  %v3762_v58 = vld [vmem:[#allocation7 + $0x1a0] ss:$16 sps:$4 sm:$0xff]   ;;  %v3763_v59 = vld [vmem:[#allocation7 + $0x1c4] ss:$16 sps:$4 sm:$0xff]  }
  0xa5   :  { %603 = vmatpush1.bf16.msra.mxu0 %v3735_v13  ;;  %v3795_v60 = vld [vmem:[#allocation7 + $0x108] ss:$16 sps:$4 sm:$0xff]   ;;  %v3796_v61 = vld [vmem:[#allocation7 + $0x12c] ss:$16 sps:$4 sm:$0xff]   ;;  %v3765_v62 = vld [vmem:[#allocation7 + $0x1c0] ss:$16 sps:$4 sm:$0xff]  }
  0xa6   :  { %604 = vmatprep.subr.bf16.mxu0 %v3736_v15  ;;  %v3766_v63 = vld [vmem:[#allocation7 + $0x1e4] ss:$16 sps:$4 sm:$0xff]   ;;  %v3798_v0 = vld [vmem:[#allocation7 + $0x128] ss:$16 sps:$4 sm:$0xff]   ;;  %v3799_v1 = vld [vmem:[#allocation7 + $0x14c] ss:$16 sps:$4 sm:$0xff]  }
  0xa7   :  { %646 = vmatpush1.bf16.msra.mxu1 %v3783_v43  ;;  %v3770_v3 = vld [vmem:[#allocation7 + $0x1e0] ss:$16 sps:$4 sm:$0xff]   ;;  %v3801_v4 = vld [vmem:[#allocation7 + $0x148] ss:$16 sps:$4 sm:$0xff]   ;;  %v3819_v5 = vld [vmem:[#allocation9 + $0x4] ss:$16 sps:$4 sm:$0xff]  }
  0xa8   :  { %v198_v42 = vld [vmem:[#allocation20] sm:$0xff]  ;;  %647 = vmatprep.subr.bf16.mxu1 %v3784_v45  ;;  %v3802_v6 = vld [vmem:[#allocation7 + $0x16c] ss:$16 sps:$4 sm:$0xff]   ;;  %v3804_v9 = vld [vmem:[#allocation7 + $0x168] ss:$16 sps:$4 sm:$0xff]  }
  0xa9   :  { %605 = vmatpush1.bf16.msra.mxu0 %v3738_v16  ;;  %v3266_v44 = vcombine.high %v198_v42, %v4693_v2  ;;  %v3265_v7 = vcombine.low %v198_v42, %v4693_v2  ;;  %v3817_v8 = vld [vmem:[#allocation9] ss:$16 sps:$4 sm:$0xff]   ;;  %v3825_v10 = vld [vmem:[#allocation9 + $0x24] ss:$16 sps:$4 sm:$0xff]   ;;  %v3805_v11 = vld [vmem:[#allocation7 + $0x18c] ss:$16 sps:$4 sm:$0xff]  }
  0xaa   :  { %606 = vmatprep.subr.bf16.mxu0 %v3739_v18  ;;  %v3823_v12 = vld [vmem:[#allocation9 + $0x20] ss:$16 sps:$4 sm:$0xff]   ;;  %v3807_v13 = vld [vmem:[#allocation7 + $0x188] ss:$16 sps:$4 sm:$0xff]   ;;  %v3831_v14 = vld [vmem:[#allocation9 + $0x44] ss:$16 sps:$4 sm:$0xff]  }
  0xab   :  { %626 = vmatprep.mubr.bf16.mxu0 %v3266_v44  ;;  %669 = vmatprep.mubr.bf16.mxu1 %v3266_v44  ;;  %v3808_v15 = vld [vmem:[#allocation7 + $0x1ac] ss:$16 sps:$4 sm:$0xff]   ;;  %v3829_v16 = vld [vmem:[#allocation9 + $0x40] ss:$16 sps:$4 sm:$0xff]   ;;  %v3810_v2 = vld [vmem:[#allocation7 + $0x1a8] ss:$16 sps:$4 sm:$0xff]  }
  0xac   :  { %648 = vmatpush1.bf16.msra.mxu1 %v3786_v48  ;;  %v3837_v17 = vld [vmem:[#allocation9 + $0x64] ss:$16 sps:$4 sm:$0xff]   ;;  %v3811_v18 = vld [vmem:[#allocation7 + $0x1cc] ss:$16 sps:$4 sm:$0xff]   ;;  %v3813_v20 = vld [vmem:[#allocation7 + $0x1c8] ss:$16 sps:$4 sm:$0xff]  }
  0xad   :  { %607 = vmatpush1.bf16.msra.mxu0 %v3741_v19  ;;  %649 = vmatprep.subr.bf16.mxu1 %v3787_v49  ;;  %v3835_v19 = vld [vmem:[#allocation9 + $0x60] ss:$16 sps:$4 sm:$0xff]   ;;  %v3814_v22 = vld [vmem:[#allocation7 + $0x1ec] ss:$16 sps:$4 sm:$0xff]   ;;  %v3816_v23 = vld [vmem:[#allocation7 + $0x1e8] ss:$16 sps:$4 sm:$0xff]  }
  0xae   :  { %608 = vmatprep.subr.bf16.mxu0 %v3742_v21  ;;  %v3843_v21 = vld [vmem:[#allocation9 + $0x84] ss:$16 sps:$4 sm:$0xff]   ;;  %v3841_v24 = vld [vmem:[#allocation9 + $0x80] ss:$16 sps:$4 sm:$0xff]   ;;  %v3822_v25 = vld [vmem:[#allocation9 + $0xc] ss:$16 sps:$4 sm:$0xff]  }
  0xaf   :  { %v3849_v26 = vld [vmem:[#allocation9 + $0xa4] ss:$16 sps:$4 sm:$0xff]   ;;  %v3847_v27 = vld [vmem:[#allocation9 + $0xa0] ss:$16 sps:$4 sm:$0xff]   ;;  %v3820_v28 = vld [vmem:[#allocation9 + $0x8] ss:$16 sps:$4 sm:$0xff]  }
  0xb0   :  { %650 = vmatpush1.bf16.msra.mxu1 %v3789_v52  ;;  %v3855_v29 = vld [vmem:[#allocation9 + $0xc4] ss:$16 sps:$4 sm:$0xff]   ;;  %v3853_v31 = vld [vmem:[#allocation9 + $0xc0] ss:$16 sps:$4 sm:$0xff]   ;;  %v3826_v32 = vld [vmem:[#allocation9 + $0x28] ss:$16 sps:$4 sm:$0xff]  }
  0xb1   :  { %609 = vmatpush1.bf16.msra.mxu0 %v3744_v30  ;;  %651 = vmatprep.subr.bf16.mxu1 %v3790_v53  ;;  %v3828_v30 = vld [vmem:[#allocation9 + $0x2c] ss:$16 sps:$4 sm:$0xff]   ;;  %v3859_v35 = vld [vmem:[#allocation9 + $0xe0] ss:$16 sps:$4 sm:$0xff]   ;;  %v3844_v44 = vld [vmem:[#allocation9 + $0x88] ss:$16 sps:$4 sm:$0xff]  }
  0xb2   :  { %610 = vmatprep.subr.bf16.mxu0 %v3745_v33  ;;  %v3861_v33 = vld [vmem:[#allocation9 + $0xe4] ss:$16 sps:$4 sm:$0xff]   ;;  %v3834_v34 = vld [vmem:[#allocation9 + $0x4c] ss:$16 sps:$4 sm:$0xff]   ;;  %v3865_v39 = vld [vmem:[#allocation9 + $0x100] ss:$16 sps:$4 sm:$0xff]  }
  0xb3   :  { %v3840_v38 = vld [vmem:[#allocation9 + $0x6c] ss:$16 sps:$4 sm:$0xff]   ;;  %v3871_v43 = vld [vmem:[#allocation9 + $0x120] ss:$16 sps:$4 sm:$0xff]   ;;  %v3879_v45 = vld [vmem:[#allocation9 + $0x144] ss:$16 sps:$4 sm:$0xff]  }
  0xb4   :  { %652 = vmatpush1.bf16.msra.mxu1 %v3792_v56  ;;  %v3846_v42 = vld [vmem:[#allocation9 + $0x8c] ss:$16 sps:$4 sm:$0xff]   ;;  %v3850_v48 = vld [vmem:[#allocation9 + $0xa8] ss:$16 sps:$4 sm:$0xff]   ;;  %v3885_v49 = vld [vmem:[#allocation9 + $0x164] ss:$16 sps:$4 sm:$0xff]  }
  0xb5   :  { %611 = vmatpush1.bf16.msra.mxu0 %v3747_v36  ;;  %653 = vmatprep.subr.bf16.mxu1 %v3793_v57  ;;  %v3832_v36 = vld [vmem:[#allocation9 + $0x48] ss:$16 sps:$4 sm:$0xff]   ;;  %v3891_v53 = vld [vmem:[#allocation9 + $0x184] ss:$16 sps:$4 sm:$0xff]  }
  0xb6   :  { %612 = vmatprep.subr.bf16.mxu0 %v3748_v37  ;;  %v3867_v37 = vld [vmem:[#allocation9 + $0x104] ss:$16 sps:$4 sm:$0xff]   ;;  %v3856_v52 = vld [vmem:[#allocation9 + $0xc8] ss:$16 sps:$4 sm:$0xff]  }
  0xb7   :  { %v3862_v56 = vld [vmem:[#allocation9 + $0xe8] ss:$16 sps:$4 sm:$0xff]   ;;  %v3897_v57 = vld [vmem:[#allocation9 + $0x1a4] ss:$16 sps:$4 sm:$0xff]  }
  0xb8   :  { %654 = vmatpush1.bf16.msra.mxu1 %v3795_v60  ;;  %v3868_v60 = vld [vmem:[#allocation9 + $0x108] ss:$16 sps:$4 sm:$0xff]  }
  0xb9   :  { %613 = vmatpush1.bf16.msra.mxu0 %v3750_v40  ;;  %655 = vmatprep.subr.bf16.mxu1 %v3796_v61  ;;  %v3838_v40 = vld [vmem:[#allocation9 + $0x68] ss:$16 sps:$4 sm:$0xff]   ;;  %v3876_v61 = vld [vmem:[#allocation9 + $0x12c] ss:$16 sps:$4 sm:$0xff]  }
  0xba   :  { %614 = vmatprep.subr.bf16.mxu0 %v3751_v41  ;;  %v3873_v41 = vld [vmem:[#allocation9 + $0x124] ss:$16 sps:$4 sm:$0xff]  }
  0xbc   :  { %656 = vmatpush1.bf16.msra.mxu1 %v3798_v0  ;;  %v3880_v0 = vld [vmem:[#allocation9 + $0x148] ss:$16 sps:$4 sm:$0xff]  }
  0xbd   :  { %615 = vmatpush1.bf16.msra.mxu0 %v3753_v46  ;;  %657 = vmatprep.subr.bf16.mxu1 %v3799_v1  ;;  %v3852_v46 = vld [vmem:[#allocation9 + $0xac] ss:$16 sps:$4 sm:$0xff]  }
  0xbe   :  { %616 = vmatprep.subr.bf16.mxu0 %v3754_v47  ;;  %v3877_v47 = vld [vmem:[#allocation9 + $0x140] ss:$16 sps:$4 sm:$0xff]   ;;  %v3888_v1 = vld [vmem:[#allocation9 + $0x16c] ss:$16 sps:$4 sm:$0xff]  }
  0xc0   :  { %658 = vmatpush1.bf16.msra.mxu1 %v3801_v4  ;;  %v3894_v4 = vld [vmem:[#allocation9 + $0x18c] ss:$16 sps:$4 sm:$0xff]  }
  0xc1   :  { %617 = vmatpush1.bf16.msra.mxu0 %v3756_v50  ;;  %659 = vmatprep.subr.bf16.mxu1 %v3802_v6  ;;  %v3858_v50 = vld [vmem:[#allocation9 + $0xcc] ss:$16 sps:$4 sm:$0xff]  }
  0xc2   :  { %618 = vmatprep.subr.bf16.mxu0 %v3757_v51  ;;  %v3883_v51 = vld [vmem:[#allocation9 + $0x160] ss:$16 sps:$4 sm:$0xff]   ;;  %v3900_v6 = vld [vmem:[#allocation9 + $0x1ac] ss:$16 sps:$4 sm:$0xff]  }
  0xc4   :  { %660 = vmatpush1.bf16.msra.mxu1 %v3804_v9  ;;  %v3906_v9 = vld [vmem:[#allocation9 + $0x1cc] ss:$16 sps:$4 sm:$0xff]  }
  0xc5   :  { %619 = vmatpush1.bf16.msra.mxu0 %v3759_v54  ;;  %661 = vmatprep.subr.bf16.mxu1 %v3805_v11  ;;  %v3864_v54 = vld [vmem:[#allocation9 + $0xec] ss:$16 sps:$4 sm:$0xff]   ;;  %v3904_v11 = vld [vmem:[#allocation9 + $0x1c8] ss:$16 sps:$4 sm:$0xff]  }
  0xc6   :  { %620 = vmatprep.subr.bf16.mxu0 %v3760_v55  ;;  %v3889_v55 = vld [vmem:[#allocation9 + $0x180] ss:$16 sps:$4 sm:$0xff]  }
  0xc8   :  { %662 = vmatpush1.bf16.msra.mxu1 %v3807_v13  ;;  %v3912_v13 = vld [vmem:[#allocation9 + $0x1ec] ss:$16 sps:$4 sm:$0xff]  }
  0xc9   :  { %621 = vmatpush1.bf16.msra.mxu0 %v3762_v58  ;;  %663 = vmatprep.subr.bf16.mxu1 %v3808_v15  ;;  %v3870_v58 = vld [vmem:[#allocation9 + $0x10c] ss:$16 sps:$4 sm:$0xff]   ;;  %v3910_v15 = vld [vmem:[#allocation9 + $0x1e8] ss:$16 sps:$4 sm:$0xff]  }
  0xca   :  { %622 = vmatprep.subr.bf16.mxu0 %v3763_v59  ;;  %v3895_v59 = vld [vmem:[#allocation9 + $0x1a0] ss:$16 sps:$4 sm:$0xff]  }
  0xcc   :  { %664 = vmatpush1.bf16.msra.mxu1 %v3810_v2  ;;  %v3918_v2 = vld [vmem:[#allocation9 + $0x20c] ss:$16 sps:$4 sm:$0xff]  }
  0xcd   :  { %623 = vmatpush1.bf16.msra.mxu0 %v3765_v62  ;;  %665 = vmatprep.subr.bf16.mxu1 %v3811_v18  ;;  %v3874_v62 = vld [vmem:[#allocation9 + $0x128] ss:$16 sps:$4 sm:$0xff]  }
  0xce   :  { %624 = vmatprep.subr.bf16.mxu0 %v3766_v63  ;;  %v3882_v63 = vld [vmem:[#allocation9 + $0x14c] ss:$16 sps:$4 sm:$0xff]  }
  0xd0   :  { %666 = vmatpush1.bf16.msra.mxu1 %v3813_v20 }
  0xd1   :  { %625 = vmatpush1.bf16.msra.mxu0 %v3770_v3  ;;  %667 = vmatprep.subr.bf16.mxu1 %v3814_v22  ;;  %v3886_v3 = vld [vmem:[#allocation9 + $0x168] ss:$16 sps:$4 sm:$0xff]  }
  0xd2   :  { %1460 = vmatprep.subr.bf16.mxu0 %v3819_v5  ;;  %v3892_v5 = vld [vmem:[#allocation9 + $0x188] ss:$16 sps:$4 sm:$0xff]  }
  0xd4   :  { %627 = vmatmul.mubr.bf16.vlgmr.msra.gmra.mrb[0].mxu0 %v3265_v7  ;;  %668 = vmatpush1.bf16.msra.mxu1 %v3816_v23 }
  0xd5   :  { %1461 = vmatpush1.bf16.msra.mxu0 %v3817_v8  ;;  %1546 = vmatprep.subr.bf16.mxu1 %v3822_v25  ;;  %v3903_v8 = vld [vmem:[#allocation9 + $0x1c4] ss:$16 sps:$4 sm:$0xff]  }
  0xd6   :  { %1462 = vmatprep.subr.bf16.mxu0 %v3825_v10  ;;  %v3901_v10 = vld [vmem:[#allocation9 + $0x1c0] ss:$16 sps:$4 sm:$0xff]  }
  0xd7   :  { %670 = vmatmul.mubr.bf16.vlgmr.msra.gmra.mrb[0].mxu1 %v3265_v7  ;;  %v3898_v7 = vld [vmem:[#allocation9 + $0x1a8] ss:$16 sps:$4 sm:$0xff]  }
  0xd8   :  { %1547 = vmatpush1.bf16.msra.mxu1 %v3820_v28  ;;  %v3916_v28 = vld [vmem:[#allocation9 + $0x208] ss:$16 sps:$4 sm:$0xff]  }
  0xd9   :  { %1463 = vmatpush1.bf16.msra.mxu0 %v3823_v12  ;;  %1548 = vmatprep.subr.bf16.mxu1 %v3828_v30  ;;  %v3909_v12 = vld [vmem:[#allocation9 + $0x1e4] ss:$16 sps:$4 sm:$0xff]   ;;  %v3924_v30 = vld [vmem:[#allocation9 + $0x22c] ss:$16 sps:$4 sm:$0xff]  }
  0xda   :  { %1464 = vmatprep.subr.bf16.mxu0 %v3831_v14  ;;  %v3907_v14 = vld [vmem:[#allocation9 + $0x1e0] ss:$16 sps:$4 sm:$0xff]  }
  0xdc   :  { %1549 = vmatpush1.bf16.msra.mxu1 %v3826_v32  ;;  %v3922_v32 = vld [vmem:[#allocation9 + $0x228] ss:$16 sps:$4 sm:$0xff]  }
  0xdd   :  { %1465 = vmatpush1.bf16.msra.mxu0 %v3829_v16  ;;  %1550 = vmatprep.subr.bf16.mxu1 %v3834_v34  ;;  %v3915_v16 = vld [vmem:[#allocation9 + $0x204] ss:$16 sps:$4 sm:$0xff]   ;;  %v3930_v34 = vld [vmem:[#allocation9 + $0x24c] ss:$16 sps:$4 sm:$0xff]  }
  0xde   :  { %1466 = vmatprep.subr.bf16.mxu0 %v3837_v17 }
  0xe0   :  { %1551 = vmatpush1.bf16.msra.mxu1 %v3832_v36  ;;  %v3928_v36 = vld [vmem:[#allocation9 + $0x248] ss:$16 sps:$4 sm:$0xff]  }
  0xe1   :  { %1467 = vmatpush1.bf16.msra.mxu0 %v3835_v19  ;;  %1552 = vmatprep.subr.bf16.mxu1 %v3840_v38  ;;  %v3936_v38 = vld [vmem:[#allocation9 + $0x26c] ss:$16 sps:$4 sm:$0xff]  }
  0xe2   :  { %1468 = vmatprep.subr.bf16.mxu0 %v3843_v21 }
  0xe4   :  { %1553 = vmatpush1.bf16.msra.mxu1 %v3838_v40  ;;  %v3934_v40 = vld [vmem:[#allocation9 + $0x268] ss:$16 sps:$4 sm:$0xff]  }
  0xe5   :  { %1469 = vmatpush1.bf16.msra.mxu0 %v3841_v24  ;;  %1554 = vmatprep.subr.bf16.mxu1 %v3846_v42  ;;  %v3942_v42 = vld [vmem:[#allocation9 + $0x28c] ss:$16 sps:$4 sm:$0xff]  }
  0xe6   :  { %1470 = vmatprep.subr.bf16.mxu0 %v3849_v26 }
  0xe8   :  { %1555 = vmatpush1.bf16.msra.mxu1 %v3844_v44  ;;  %v3937_v44 = vld [vmem:[#allocation9 + $0x280] ss:$16 sps:$4 sm:$0xff]  }
  0xe9   :  { %1471 = vmatpush1.bf16.msra.mxu0 %v3847_v27  ;;  %1556 = vmatprep.subr.bf16.mxu1 %v3852_v46  ;;  %v3913_v27 = vld [vmem:[#allocation9 + $0x200] ss:$16 sps:$4 sm:$0xff]  }
  0xea   :  { %1472 = vmatprep.subr.bf16.mxu0 %v3855_v29  ;;  %v3921_v29 = vld [vmem:[#allocation9 + $0x224] ss:$16 sps:$4 sm:$0xff]  }
  0xec   :  { %1557 = vmatpush1.bf16.msra.mxu1 %v3850_v48  ;;  %v3945_v48 = vld [vmem:[#allocation9 + $0x2a4] ss:$16 sps:$4 sm:$0xff]  }
  0xed   :  { %1473 = vmatpush1.bf16.msra.mxu0 %v3853_v31  ;;  %1558 = vmatprep.subr.bf16.mxu1 %v3858_v50  ;;  %v3919_v31 = vld [vmem:[#allocation9 + $0x220] ss:$16 sps:$4 sm:$0xff]  }
  0xee   :  { %1474 = vmatprep.subr.bf16.mxu0 %v3861_v33  ;;  %v3927_v33 = vld [vmem:[#allocation9 + $0x244] ss:$16 sps:$4 sm:$0xff]  }
  0xf0   :  { %1559 = vmatpush1.bf16.msra.mxu1 %v3856_v52 }
  0xf1   :  { %1475 = vmatpush1.bf16.msra.mxu0 %v3859_v35  ;;  %1560 = vmatprep.subr.bf16.mxu1 %v3864_v54  ;;  %v3925_v35 = vld [vmem:[#allocation9 + $0x240] ss:$16 sps:$4 sm:$0xff]  }
  0xf2   :  { %1476 = vmatprep.subr.bf16.mxu0 %v3867_v37  ;;  %v3933_v37 = vld [vmem:[#allocation9 + $0x264] ss:$16 sps:$4 sm:$0xff]  }
  0xf4   :  { %1561 = vmatpush1.bf16.msra.mxu1 %v3862_v56  ;;  %v3946_v56 = vld [vmem:[#allocation9 + $0x2a8] ss:$16 sps:$4 sm:$0xff]  }
  0xf5   :  { %1477 = vmatpush1.bf16.msra.mxu0 %v3865_v39  ;;  %1562 = vmatprep.subr.bf16.mxu1 %v3870_v58  ;;  %v3931_v39 = vld [vmem:[#allocation9 + $0x260] ss:$16 sps:$4 sm:$0xff]   ;;  %v3951_v58 = vld [vmem:[#allocation9 + $0x2c4] ss:$16 sps:$4 sm:$0xff]  }
  0xf6   :  { %1478 = vmatprep.subr.bf16.mxu0 %v3873_v41  ;;  %v3939_v41 = vld [vmem:[#allocation9 + $0x284] ss:$16 sps:$4 sm:$0xff]  }
  0xf8   :  { %1563 = vmatpush1.bf16.msra.mxu1 %v3868_v60 }
  0xf9   :  { %1479 = vmatpush1.bf16.msra.mxu0 %v3871_v43  ;;  %1564 = vmatprep.subr.bf16.mxu1 %v3876_v61  ;;  %v3949_v61 = vld [vmem:[#allocation9 + $0x2c0] ss:$16 sps:$4 sm:$0xff]  }
  0xfa   :  { %1480 = vmatprep.subr.bf16.mxu0 %v3879_v45  ;;  %v3940_v45 = vld [vmem:[#allocation9 + $0x288] ss:$16 sps:$4 sm:$0xff]  }
  0xfc   :  { %1565 = vmatpush1.bf16.msra.mxu1 %v3874_v62  ;;  %v3952_v62 = vld [vmem:[#allocation9 + $0x2c8] ss:$16 sps:$4 sm:$0xff]  }
  0xfd   :  { %1481 = vmatpush1.bf16.msra.mxu0 %v3877_v47  ;;  %1566 = vmatprep.subr.bf16.mxu1 %v3882_v63  ;;  %v3957_v63 = vld [vmem:[#allocation9 + $0x2e4] ss:$16 sps:$4 sm:$0xff]  }
  0xfe   :  { %1482 = vmatprep.subr.bf16.mxu0 %v3885_v49  ;;  %v3948_v49 = vld [vmem:[#allocation9 + $0x2ac] ss:$16 sps:$4 sm:$0xff]  }
 0x100   :  { %1567 = vmatpush1.bf16.msra.mxu1 %v3880_v0  ;;  %v3960_v0 = vld [vmem:[#allocation9 + $0x2ec] ss:$16 sps:$4 sm:$0xff]  }
 0x101   :  { %1483 = vmatpush1.bf16.msra.mxu0 %v3883_v51  ;;  %1568 = vmatprep.subr.bf16.mxu1 %v3888_v1  ;;  %v3955_v1 = vld [vmem:[#allocation9 + $0x2e0] ss:$16 sps:$4 sm:$0xff]  }
 0x102   :  { %1484 = vmatprep.subr.bf16.mxu0 %v3891_v53 }
 0x104   :  { %1569 = vmatpush1.bf16.msra.mxu1 %v3886_v3  ;;  %v3958_v3 = vld [vmem:[#allocation9 + $0x2e8] ss:$16 sps:$4 sm:$0xff]  }
 0x105   :  { %1485 = vmatpush1.bf16.msra.mxu0 %v3889_v55  ;;  %1570 = vmatprep.subr.bf16.mxu1 %v3894_v4  ;;  %v3943_v55 = vld [vmem:[#allocation9 + $0x2a0] ss:$16 sps:$4 sm:$0xff]   ;;  %v3963_v4 = vld [vmem:[#allocation9 + $0x304] ss:$16 sps:$4 sm:$0xff]  }
 0x106   :  { %1486 = vmatprep.subr.bf16.mxu0 %v3897_v57 }
 0x108   :  { %1571 = vmatpush1.bf16.msra.mxu1 %v3892_v5  ;;  %v3966_v5 = vld [vmem:[#allocation9 + $0x30c] ss:$16 sps:$4 sm:$0xff]  }
 0x109   :  { %1487 = vmatpush1.bf16.msra.mxu0 %v3895_v59  ;;  %1572 = vmatprep.subr.bf16.mxu1 %v3900_v6  ;;  %v3954_v59 = vld [vmem:[#allocation9 + $0x2cc] ss:$16 sps:$4 sm:$0xff]   ;;  %v3961_v6 = vld [vmem:[#allocation9 + $0x300] ss:$16 sps:$4 sm:$0xff]  }
 0x10a   :  { %1488 = vmatprep.subr.bf16.mxu0 %v3903_v8  ;;  %v3969_v8 = vld [vmem:[#allocation9 + $0x324] ss:$16 sps:$4 sm:$0xff]  }
 0x10c   :  { %1573 = vmatpush1.bf16.msra.mxu1 %v3898_v7  ;;  %v3964_v7 = vld [vmem:[#allocation9 + $0x308] ss:$16 sps:$4 sm:$0xff]  }
 0x10d   :  { %1574 = vmatprep.subr.bf16.mxu1 %v3906_v9  ;;  %1489 = vmatpush1.bf16.msra.mxu0 %v3901_v10  ;;  %v3972_v9 = vld [vmem:[#allocation9 + $0x32c] ss:$16 sps:$4 sm:$0xff]   ;;  %v3967_v10 = vld [vmem:[#allocation9 + $0x320] ss:$16 sps:$4 sm:$0xff]  }
 0x10e   :  { %1490 = vmatprep.subr.bf16.mxu0 %v3909_v12  ;;  %v3975_v12 = vld [vmem:[#allocation9 + $0x344] ss:$16 sps:$4 sm:$0xff]  }
 0x110   :  { %1575 = vmatpush1.bf16.msra.mxu1 %v3904_v11  ;;  %v3970_v11 = vld [vmem:[#allocation9 + $0x328] ss:$16 sps:$4 sm:$0xff]  }
 0x111   :  { %1576 = vmatprep.subr.bf16.mxu1 %v3912_v13  ;;  %1491 = vmatpush1.bf16.msra.mxu0 %v3907_v14  ;;  %v3978_v13 = vld [vmem:[#allocation9 + $0x34c] ss:$16 sps:$4 sm:$0xff]   ;;  %v3973_v14 = vld [vmem:[#allocation9 + $0x340] ss:$16 sps:$4 sm:$0xff]  }
 0x112   :  { %1503 = vmatprep.subr.bf16.mxu0 %v3915_v16  ;;  %v3981_v16 = vld [vmem:[#allocation9 + $0x364] ss:$16 sps:$4 sm:$0xff]  }
 0x114   :  { %1577 = vmatpush1.bf16.msra.mxu1 %v3910_v15  ;;  %v3976_v15 = vld [vmem:[#allocation9 + $0x348] ss:$16 sps:$4 sm:$0xff]  }
 0x115   :  { %1589 = vmatprep.subr.bf16.mxu1 %v3918_v2  ;;  %v3984_v2 = vld [vmem:[#allocation9 + $0x36c] ss:$16 sps:$4 sm:$0xff]  }
 0x1a7   :  { %v628_v17 = vpop.f32.mrb[0].mxu0 }
 0x1a8   :  { %v630_v18 = vpop.f32.mrb[1].mxu0  ;;  %v680_v20 = vmax.f32 %v628_v17, 0.0  ;;  %v3979_v17 = vld [vmem:[#allocation9 + $0x360] ss:$16 sps:$4 sm:$0xff]  }
 0x1a9   :  { %v632_v19 = vpop.f32.mrb[2].mxu0  ;;  %v681_v23 = vmax.f32 %v630_v18, 0.0  ;;  %v3982_v18 = vld [vmem:[#allocation9 + $0x368] ss:$16 sps:$4 sm:$0xff]  }
 0x1aa   :  { %v684_v21 = vmax.f32 %v632_v19, 0.0  ;;  %v634_v22 = vpop.f32.mrb[3].mxu0  ;;  %v671_v43 = vpop.f32.mrb[0].mxu1  ;;  %v3987_v19 = vld [vmem:[#allocation9 + $0x384] ss:$16 sps:$4 sm:$0xff]  }
 0x1ab   :  { %v685_v24 = vmax.f32 %v634_v22, 0.0  ;;  %v682_v46 = vmax.f32 %v671_v43, 0.0  ;;  %v673_v47 = vpop.f32.mrb[1].mxu1  ;;  %v3988_v22 = vld [vmem:[#allocation9 + $0x388] ss:$16 sps:$4 sm:$0xff]  }
 0x1ac   :  { %v688_v25 = vpack.c.bf16 %v684_v21, %v680_v20  ;;  %v683_v50 = vmax.f32 %v673_v47, 0.0  ;;  %v675_v51 = vpop.f32.mrb[2].mxu1  ;;  %v3990_v20 = vld [vmem:[#allocation9 + $0x38c] ss:$16 sps:$4 sm:$0xff]   ;;  %v3985_v21 = vld [vmem:[#allocation9 + $0x380] ss:$16 sps:$4 sm:$0xff]  }
 0x1ad   :  { %v689_v26 = vpack.c.bf16 %v685_v24, %v681_v23  ;;  %v686_v52 = vmax.f32 %v675_v51, 0.0  ;;  %v677_v53 = vpop.f32.mrb[3].mxu1  ;;  %v3993_v23 = vld [vmem:[#allocation9 + $0x3a4] ss:$16 sps:$4 sm:$0xff]   ;;  %v3996_v24 = vld [vmem:[#allocation9 + $0x3ac] ss:$16 sps:$4 sm:$0xff]  }
 0x1ae   :  { %v687_v54 = vmax.f32 %v677_v53, 0.0  ;;  %v4023_v43 = vld [vmem:[#allocation11 + $0x44] ss:$8 sps:$4 sm:$0xff]   ;;  %v4038_v53 = vld [vmem:[#allocation11 + $0x94] ss:$8 sps:$4 sm:$0xff]  }
 0x1af   :  { %1492 = vmatprep.mubr.bf16.mxu0 %v689_v26  ;;  %1578 = vmatprep.mubr.bf16.mxu1 %v689_v26  ;;  %v4704_v57 = vpack.c.bf16 %v686_v52, %v682_v46  ;;  %v3994_v26 = vld [vmem:[#allocation9 + $0x3a8] ss:$16 sps:$4 sm:$0xff]   ;;  %v4029_v47 = vld [vmem:[#allocation11 + $0x64] ss:$8 sps:$4 sm:$0xff]  }
 0x1b0   :  { %1493 = vmatmul.mubr.bf16.vlgmr.msra.gmra.mrb[4].mxu0 %v688_v25  ;;  %1579 = vmatmul.mubr.bf16.vlgmr.msra.gmra.mrb[4].mxu1 %v688_v25  ;;  %v691_v60 = vpack.c.bf16 %v687_v54, %v683_v50  ;;  %v3991_v25 = vld [vmem:[#allocation9 + $0x3a0] ss:$16 sps:$4 sm:$0xff]   ;;  %v4035_v51 = vld [vmem:[#allocation11 + $0x84] ss:$8 sps:$4 sm:$0xff]  }
 0x1b1   :  { %1504 = vmatpush1.bf16.msra.mxu0 %v3913_v27  ;;  %1590 = vmatpush1.bf16.msra.mxu1 %v3916_v28  ;;  %v3999_v27 = vld [vmem:[#allocation9 + $0x3c4] ss:$16 sps:$4 sm:$0xff]   ;;  %v4002_v28 = vld [vmem:[#allocation9 + $0x3cc] ss:$16 sps:$4 sm:$0xff]   ;;  %v4024_v46 = vld [vmem:[#allocation11 + $0x50] ss:$8 sps:$4 sm:$0xff]  }
 0x1b2   :  { %1505 = vmatprep.subr.bf16.mxu0 %v3921_v29  ;;  %1591 = vmatprep.subr.bf16.mxu1 %v3924_v30  ;;  %v3997_v29 = vld [vmem:[#allocation9 + $0x3c0] ss:$16 sps:$4 sm:$0xff]   ;;  %v4000_v30 = vld [vmem:[#allocation9 + $0x3c8] ss:$16 sps:$4 sm:$0xff]  }
 0x1b3   :  { %1535 = vmatprep.mubr.bf16.mxu0 %v691_v60  ;;  %1621 = vmatprep.mubr.bf16.mxu1 %v691_v60  ;;  %v4030_v50 = vld [vmem:[#allocation11 + $0x70] ss:$8 sps:$4 sm:$0xff]   ;;  %v4033_v52 = vld [vmem:[#allocation11 + $0x80] ss:$8 sps:$4 sm:$0xff]  }
 0x1b4   :  { %v4036_v54 = vld [vmem:[#allocation11 + $0x90] ss:$8 sps:$4 sm:$0xff]   ;;  %v4045_v60 = vld [vmem:[#allocation11 + $0xc0] ss:$8 sps:$4 sm:$0xff]  }
 0x1b5   :  { %1506 = vmatpush1.bf16.msra.mxu0 %v3919_v31  ;;  %1592 = vmatpush1.bf16.msra.mxu1 %v3922_v32  ;;  %v4005_v31 = vld [vmem:[#allocation9 + $0x3e4] ss:$16 sps:$4 sm:$0xff]   ;;  %v4008_v32 = vld [vmem:[#allocation9 + $0x3ec] ss:$16 sps:$4 sm:$0xff]  }
 0x1b6   :  { %1507 = vmatprep.subr.bf16.mxu0 %v3927_v33  ;;  %1593 = vmatprep.subr.bf16.mxu1 %v3930_v34  ;;  %v4003_v33 = vld [vmem:[#allocation9 + $0x3e0] ss:$16 sps:$4 sm:$0xff]   ;;  %v4006_v34 = vld [vmem:[#allocation9 + $0x3e8] ss:$16 sps:$4 sm:$0xff]  }
 0x1b9   :  { %1508 = vmatpush1.bf16.msra.mxu0 %v3925_v35  ;;  %1594 = vmatpush1.bf16.msra.mxu1 %v3928_v36  ;;  %v4011_v35 = vld [vmem:[#allocation11 + $0x4] ss:$8 sps:$4 sm:$0xff]   ;;  %v4009_v36 = vld [vmem:[#allocation11] ss:$8 sps:$4 sm:$0xff]  }
 0x1ba   :  { %1509 = vmatprep.subr.bf16.mxu0 %v3933_v37  ;;  %1595 = vmatprep.subr.bf16.mxu1 %v3936_v38  ;;  %v4014_v37 = vld [vmem:[#allocation11 + $0x14] ss:$8 sps:$4 sm:$0xff]   ;;  %v4012_v38 = vld [vmem:[#allocation11 + $0x10] ss:$8 sps:$4 sm:$0xff]  }
 0x1bd   :  { %1510 = vmatpush1.bf16.msra.mxu0 %v3931_v39  ;;  %1596 = vmatpush1.bf16.msra.mxu1 %v3934_v40  ;;  %v4017_v39 = vld [vmem:[#allocation11 + $0x24] ss:$8 sps:$4 sm:$0xff]   ;;  %v4015_v40 = vld [vmem:[#allocation11 + $0x20] ss:$8 sps:$4 sm:$0xff]  }
 0x1be   :  { %1511 = vmatprep.subr.bf16.mxu0 %v3939_v41  ;;  %1597 = vmatprep.subr.bf16.mxu1 %v3942_v42  ;;  %v4020_v41 = vld [vmem:[#allocation11 + $0x34] ss:$8 sps:$4 sm:$0xff]   ;;  %v4018_v42 = vld [vmem:[#allocation11 + $0x30] ss:$8 sps:$4 sm:$0xff]  }
 0x1c1   :  { %1512 = vmatpush1.bf16.msra.mxu0 %v3937_v44  ;;  %1598 = vmatpush1.bf16.msra.mxu1 %v3940_v45  ;;  %v4021_v44 = vld [vmem:[#allocation11 + $0x40] ss:$8 sps:$4 sm:$0xff]   ;;  %v4026_v45 = vld [vmem:[#allocation11 + $0x54] ss:$8 sps:$4 sm:$0xff]  }
 0x1c2   :  { %1513 = vmatprep.subr.bf16.mxu0 %v3945_v48  ;;  %1599 = vmatprep.subr.bf16.mxu1 %v3948_v49  ;;  %v4027_v48 = vld [vmem:[#allocation11 + $0x60] ss:$8 sps:$4 sm:$0xff]   ;;  %v4032_v49 = vld [vmem:[#allocation11 + $0x74] ss:$8 sps:$4 sm:$0xff]  }
 0x1c5   :  { %1514 = vmatpush1.bf16.msra.mxu0 %v3943_v55  ;;  %1600 = vmatpush1.bf16.msra.mxu1 %v3946_v56  ;;  %v4041_v55 = vld [vmem:[#allocation11 + $0xa4] ss:$8 sps:$4 sm:$0xff]   ;;  %v4039_v56 = vld [vmem:[#allocation11 + $0xa0] ss:$8 sps:$4 sm:$0xff]  }
 0x1c6   :  { %1515 = vmatprep.subr.bf16.mxu0 %v3951_v58  ;;  %1601 = vmatprep.subr.bf16.mxu1 %v3954_v59  ;;  %v4042_v58 = vld [vmem:[#allocation11 + $0xb0] ss:$8 sps:$4 sm:$0xff]   ;;  %v4047_v59 = vld [vmem:[#allocation11 + $0xc4] ss:$8 sps:$4 sm:$0xff]  }
 0x1c9   :  { %1516 = vmatpush1.bf16.msra.mxu0 %v3949_v61  ;;  %1602 = vmatpush1.bf16.msra.mxu1 %v3952_v62  ;;  %v4050_v61 = vld [vmem:[#allocation11 + $0xd4] ss:$8 sps:$4 sm:$0xff]   ;;  %v4048_v62 = vld [vmem:[#allocation11 + $0xd0] ss:$8 sps:$4 sm:$0xff]  }
 0x1ca   :  { %1517 = vmatprep.subr.bf16.mxu0 %v3957_v63  ;;  %1603 = vmatprep.subr.bf16.mxu1 %v3960_v0  ;;  %v4053_v63 = vld [vmem:[#allocation11 + $0xe4] ss:$8 sps:$4 sm:$0xff]   ;;  %v4051_v0 = vld [vmem:[#allocation11 + $0xe0] ss:$8 sps:$4 sm:$0xff]  }
 0x1cd   :  { %1518 = vmatpush1.bf16.msra.mxu0 %v3955_v1  ;;  %1604 = vmatpush1.bf16.msra.mxu1 %v3958_v3  ;;  %v4056_v1 = vld [vmem:[#allocation11 + $0xf4] ss:$8 sps:$4 sm:$0xff]   ;;  %v4054_v3 = vld [vmem:[#allocation11 + $0xf0] ss:$8 sps:$4 sm:$0xff]  }
 0x1ce   :  { %1519 = vmatprep.subr.bf16.mxu0 %v3963_v4  ;;  %1605 = vmatprep.subr.bf16.mxu1 %v3966_v5  ;;  %v4059_v4 = vld [vmem:[#allocation11 + $0x104] ss:$8 sps:$4 sm:$0xff]   ;;  %v4105_v5 = vld [vmem:[#allocation12] ss:$8 sps:$4 sm:$0xff]  }
 0x1d1   :  { %1520 = vmatpush1.bf16.msra.mxu0 %v3961_v6  ;;  %1606 = vmatpush1.bf16.msra.mxu1 %v3964_v7  ;;  %v4107_v6 = vld [vmem:[#allocation12 + $0x4] ss:$8 sps:$4 sm:$0xff]   ;;  %v4110_v7 = vld [vmem:[#allocation12 + $0x14] ss:$8 sps:$4 sm:$0xff]  }
 0x1d2   :  { %1521 = vmatprep.subr.bf16.mxu0 %v3969_v8  ;;  %1607 = vmatprep.subr.bf16.mxu1 %v3972_v9  ;;  %v4108_v8 = vld [vmem:[#allocation12 + $0x10] ss:$8 sps:$4 sm:$0xff]   ;;  %v4113_v9 = vld [vmem:[#allocation12 + $0x24] ss:$8 sps:$4 sm:$0xff]  }
 0x1d5   :  { %1522 = vmatpush1.bf16.msra.mxu0 %v3967_v10  ;;  %1608 = vmatpush1.bf16.msra.mxu1 %v3970_v11  ;;  %v4111_v10 = vld [vmem:[#allocation12 + $0x20] ss:$8 sps:$4 sm:$0xff]   ;;  %v4116_v11 = vld [vmem:[#allocation12 + $0x34] ss:$8 sps:$4 sm:$0xff]  }
 0x1d6   :  { %1523 = vmatprep.subr.bf16.mxu0 %v3975_v12  ;;  %1609 = vmatprep.subr.bf16.mxu1 %v3978_v13  ;;  %v4114_v12 = vld [vmem:[#allocation12 + $0x30] ss:$8 sps:$4 sm:$0xff]   ;;  %v4119_v13 = vld [vmem:[#allocation12 + $0x44] ss:$8 sps:$4 sm:$0xff]  }
 0x1d9   :  { %1524 = vmatpush1.bf16.msra.mxu0 %v3973_v14  ;;  %1610 = vmatpush1.bf16.msra.mxu1 %v3976_v15  ;;  %v4117_v14 = vld [vmem:[#allocation12 + $0x40] ss:$8 sps:$4 sm:$0xff]   ;;  %v4122_v15 = vld [vmem:[#allocation12 + $0x54] ss:$8 sps:$4 sm:$0xff]  }
 0x1da   :  { %1525 = vmatprep.subr.bf16.mxu0 %v3981_v16  ;;  %1611 = vmatprep.subr.bf16.mxu1 %v3984_v2  ;;  %v4120_v16 = vld [vmem:[#allocation12 + $0x50] ss:$8 sps:$4 sm:$0xff]   ;;  %v4125_v2 = vld [vmem:[#allocation12 + $0x64] ss:$8 sps:$4 sm:$0xff]  }
 0x1dd   :  { %1526 = vmatpush1.bf16.msra.mxu0 %v3979_v17  ;;  %1612 = vmatpush1.bf16.msra.mxu1 %v3982_v18  ;;  %v4123_v17 = vld [vmem:[#allocation12 + $0x60] ss:$8 sps:$4 sm:$0xff]   ;;  %v4128_v18 = vld [vmem:[#allocation12 + $0x74] ss:$8 sps:$4 sm:$0xff]  }
 0x1de   :  { %1527 = vmatprep.subr.bf16.mxu0 %v3987_v19  ;;  %1613 = vmatprep.subr.bf16.mxu1 %v3990_v20  ;;  %v4126_v19 = vld [vmem:[#allocation12 + $0x70] ss:$8 sps:$4 sm:$0xff]   ;;  %v4131_v20 = vld [vmem:[#allocation12 + $0x84] ss:$8 sps:$4 sm:$0xff]  }
 0x1e1   :  { %1528 = vmatpush1.bf16.msra.mxu0 %v3985_v21  ;;  %1614 = vmatpush1.bf16.msra.mxu1 %v3988_v22  ;;  %v4129_v21 = vld [vmem:[#allocation12 + $0x80] ss:$8 sps:$4 sm:$0xff]   ;;  %v4134_v22 = vld [vmem:[#allocation12 + $0x94] ss:$8 sps:$4 sm:$0xff]  }
 0x1e2   :  { %1529 = vmatprep.subr.bf16.mxu0 %v3993_v23  ;;  %1615 = vmatprep.subr.bf16.mxu1 %v3996_v24  ;;  %v4132_v23 = vld [vmem:[#allocation12 + $0x90] ss:$8 sps:$4 sm:$0xff]   ;;  %v4137_v24 = vld [vmem:[#allocation12 + $0xa4] ss:$8 sps:$4 sm:$0xff]  }
 0x1e5   :  { %1530 = vmatpush1.bf16.msra.mxu0 %v3991_v25  ;;  %1616 = vmatpush1.bf16.msra.mxu1 %v3994_v26  ;;  %v4135_v25 = vld [vmem:[#allocation12 + $0xa0] ss:$8 sps:$4 sm:$0xff]   ;;  %v4140_v26 = vld [vmem:[#allocation12 + $0xb4] ss:$8 sps:$4 sm:$0xff]  }
 0x1e6   :  { %1531 = vmatprep.subr.bf16.mxu0 %v3999_v27  ;;  %1617 = vmatprep.subr.bf16.mxu1 %v4002_v28  ;;  %v4138_v27 = vld [vmem:[#allocation12 + $0xb0] ss:$8 sps:$4 sm:$0xff]   ;;  %v4143_v28 = vld [vmem:[#allocation12 + $0xc4] ss:$8 sps:$4 sm:$0xff]  }
 0x1e9   :  { %1532 = vmatpush1.bf16.msra.mxu0 %v3997_v29  ;;  %1618 = vmatpush1.bf16.msra.mxu1 %v4000_v30  ;;  %v4141_v29 = vld [vmem:[#allocation12 + $0xc0] ss:$8 sps:$4 sm:$0xff]   ;;  %v4146_v30 = vld [vmem:[#allocation12 + $0xd4] ss:$8 sps:$4 sm:$0xff]  }
 0x1ea   :  { %1533 = vmatprep.subr.bf16.mxu0 %v4005_v31  ;;  %1619 = vmatprep.subr.bf16.mxu1 %v4008_v32  ;;  %v4144_v31 = vld [vmem:[#allocation12 + $0xd0] ss:$8 sps:$4 sm:$0xff]  }
 0x1ed   :  { %1534 = vmatpush1.bf16.msra.mxu0 %v4003_v33  ;;  %1620 = vmatpush1.bf16.msra.mxu1 %v4006_v34 }
 0x1ee   :  { %2028 = vmatprep.subr.bf16.mxu0 %v4011_v35  ;;  %2312 = vmatprep.subr.bf16.mxu1 %v4107_v6  ;;  %v4086_v6 = vld [vmem:[#allocation11 + $0x194] ss:$8 sps:$4 sm:$0xff]  }
 0x1f0   :  { %1536 = vmatmul.mubr.bf16.vlgmr.msra.gmra.mrb[4].mxu0 %v4704_v57  ;;  %1622 = vmatmul.mubr.bf16.vlgmr.msra.gmra.mrb[4].mxu1 %v4704_v57  ;;  %v4044_v57 = vld [vmem:[#allocation11 + $0xb4] ss:$8 sps:$4 sm:$0xff]  }
 0x1f1   :  { %2029 = vmatpush1.bf16.msra.mxu0 %v4009_v36  ;;  %2313 = vmatpush1.bf16.msra.mxu1 %v4105_v5  ;;  %v4081_v5 = vld [vmem:[#allocation11 + $0x180] ss:$8 sps:$4 sm:$0xff]  }
 0x1f2   :  { %2030 = vmatprep.subr.bf16.mxu0 %v4014_v37  ;;  %2314 = vmatprep.subr.bf16.mxu1 %v4110_v7  ;;  %v4084_v7 = vld [vmem:[#allocation11 + $0x190] ss:$8 sps:$4 sm:$0xff]  }
 0x1f5   :  { %2031 = vmatpush1.bf16.msra.mxu0 %v4012_v38  ;;  %2315 = vmatpush1.bf16.msra.mxu1 %v4108_v8  ;;  %v4089_v8 = vld [vmem:[#allocation11 + $0x1a4] ss:$8 sps:$4 sm:$0xff]  }
 0x1f6   :  { %2032 = vmatprep.subr.bf16.mxu0 %v4017_v39  ;;  %2316 = vmatprep.subr.bf16.mxu1 %v4113_v9  ;;  %v4087_v9 = vld [vmem:[#allocation11 + $0x1a0] ss:$8 sps:$4 sm:$0xff]  }
 0x1f9   :  { %2033 = vmatpush1.bf16.msra.mxu0 %v4015_v40  ;;  %2317 = vmatpush1.bf16.msra.mxu1 %v4111_v10  ;;  %v4092_v10 = vld [vmem:[#allocation11 + $0x1b4] ss:$8 sps:$4 sm:$0xff]  }
 0x1fa   :  { %2034 = vmatprep.subr.bf16.mxu0 %v4020_v41  ;;  %2318 = vmatprep.subr.bf16.mxu1 %v4116_v11  ;;  %v4090_v11 = vld [vmem:[#allocation11 + $0x1b0] ss:$8 sps:$4 sm:$0xff]  }
 0x1fd   :  { %2035 = vmatpush1.bf16.msra.mxu0 %v4018_v42  ;;  %2319 = vmatpush1.bf16.msra.mxu1 %v4114_v12  ;;  %v4095_v12 = vld [vmem:[#allocation11 + $0x1c4] ss:$8 sps:$4 sm:$0xff]  }
 0x1fe   :  { %2036 = vmatprep.subr.bf16.mxu0 %v4023_v43  ;;  %2320 = vmatprep.subr.bf16.mxu1 %v4119_v13  ;;  %v4093_v13 = vld [vmem:[#allocation11 + $0x1c0] ss:$8 sps:$4 sm:$0xff]  }
 0x201   :  { %2037 = vmatpush1.bf16.msra.mxu0 %v4021_v44  ;;  %2321 = vmatpush1.bf16.msra.mxu1 %v4117_v14  ;;  %v4098_v14 = vld [vmem:[#allocation11 + $0x1d4] ss:$8 sps:$4 sm:$0xff]  }
 0x202   :  { %2038 = vmatprep.subr.bf16.mxu0 %v4026_v45  ;;  %2322 = vmatprep.subr.bf16.mxu1 %v4122_v15  ;;  %v4096_v15 = vld [vmem:[#allocation11 + $0x1d0] ss:$8 sps:$4 sm:$0xff]  }
 0x205   :  { %2039 = vmatpush1.bf16.msra.mxu0 %v4024_v46  ;;  %2323 = vmatpush1.bf16.msra.mxu1 %v4120_v16  ;;  %v4101_v16 = vld [vmem:[#allocation11 + $0x1e4] ss:$8 sps:$4 sm:$0xff]  }
 0x206   :  { %2040 = vmatprep.subr.bf16.mxu0 %v4029_v47  ;;  %2324 = vmatprep.subr.bf16.mxu1 %v4125_v2  ;;  %v4099_v2 = vld [vmem:[#allocation11 + $0x1e0] ss:$8 sps:$4 sm:$0xff]  }
 0x209   :  { %2041 = vmatpush1.bf16.msra.mxu0 %v4027_v48  ;;  %2325 = vmatpush1.bf16.msra.mxu1 %v4123_v17  ;;  %v4104_v17 = vld [vmem:[#allocation11 + $0x1f4] ss:$8 sps:$4 sm:$0xff]  }
 0x20a   :  { %2042 = vmatprep.subr.bf16.mxu0 %v4032_v49  ;;  %2326 = vmatprep.subr.bf16.mxu1 %v4128_v18  ;;  %v4102_v18 = vld [vmem:[#allocation11 + $0x1f0] ss:$8 sps:$4 sm:$0xff]  }
 0x20d   :  { %2043 = vmatpush1.bf16.msra.mxu0 %v4030_v50  ;;  %2327 = vmatpush1.bf16.msra.mxu1 %v4126_v19  ;;  %v4149_v19 = vld [vmem:[#allocation12 + $0xe4] ss:$8 sps:$4 sm:$0xff]  }
 0x20e   :  { %2044 = vmatprep.subr.bf16.mxu0 %v4035_v51  ;;  %2328 = vmatprep.subr.bf16.mxu1 %v4131_v20  ;;  %v4147_v20 = vld [vmem:[#allocation12 + $0xe0] ss:$8 sps:$4 sm:$0xff]  }
 0x211   :  { %2045 = vmatpush1.bf16.msra.mxu0 %v4033_v52  ;;  %2329 = vmatpush1.bf16.msra.mxu1 %v4129_v21  ;;  %v4057_v52 = vld [vmem:[#allocation11 + $0x100] ss:$8 sps:$4 sm:$0xff]   ;;  %v4152_v21 = vld [vmem:[#allocation12 + $0xf4] ss:$8 sps:$4 sm:$0xff]  }
 0x212   :  { %2046 = vmatprep.subr.bf16.mxu0 %v4038_v53  ;;  %2330 = vmatprep.subr.bf16.mxu1 %v4134_v22  ;;  %v4062_v53 = vld [vmem:[#allocation11 + $0x114] ss:$8 sps:$4 sm:$0xff]   ;;  %v4150_v22 = vld [vmem:[#allocation12 + $0xf0] ss:$8 sps:$4 sm:$0xff]  }
 0x215   :  { %2047 = vmatpush1.bf16.msra.mxu0 %v4036_v54  ;;  %2331 = vmatpush1.bf16.msra.mxu1 %v4132_v23  ;;  %v4060_v54 = vld [vmem:[#allocation11 + $0x110] ss:$8 sps:$4 sm:$0xff]   ;;  %v4155_v23 = vld [vmem:[#allocation14 + $0x4] ss:$8 sps:$4 sm:$0xff]  }
 0x216   :  { %2048 = vmatprep.subr.bf16.mxu0 %v4041_v55  ;;  %2332 = vmatprep.subr.bf16.mxu1 %v4137_v24  ;;  %v4065_v55 = vld [vmem:[#allocation11 + $0x124] ss:$8 sps:$4 sm:$0xff]  }
 0x219   :  { %2049 = vmatpush1.bf16.msra.mxu0 %v4039_v56  ;;  %2333 = vmatpush1.bf16.msra.mxu1 %v4135_v25  ;;  %v4063_v56 = vld [vmem:[#allocation11 + $0x120] ss:$8 sps:$4 sm:$0xff]  }
 0x21a   :  { %2050 = vmatprep.subr.bf16.mxu0 %v4044_v57  ;;  %2334 = vmatprep.subr.bf16.mxu1 %v4140_v26  ;;  %v4068_v57 = vld [vmem:[#allocation11 + $0x134] ss:$8 sps:$4 sm:$0xff]  }
 0x21d   :  { %2051 = vmatpush1.bf16.msra.mxu0 %v4042_v58  ;;  %2335 = vmatpush1.bf16.msra.mxu1 %v4138_v27  ;;  %v4066_v58 = vld [vmem:[#allocation11 + $0x130] ss:$8 sps:$4 sm:$0xff]  }
 0x21e   :  { %2052 = vmatprep.subr.bf16.mxu0 %v4047_v59  ;;  %2336 = vmatprep.subr.bf16.mxu1 %v4143_v28  ;;  %v4071_v59 = vld [vmem:[#allocation11 + $0x144] ss:$8 sps:$4 sm:$0xff]  }
 0x221   :  { %2053 = vmatpush1.bf16.msra.mxu0 %v4045_v60  ;;  %2337 = vmatpush1.bf16.msra.mxu1 %v4141_v29  ;;  %v4069_v60 = vld [vmem:[#allocation11 + $0x140] ss:$8 sps:$4 sm:$0xff]  }
 0x222   :  { %2054 = vmatprep.subr.bf16.mxu0 %v4050_v61  ;;  %2338 = vmatprep.subr.bf16.mxu1 %v4146_v30  ;;  %v4074_v61 = vld [vmem:[#allocation11 + $0x154] ss:$8 sps:$4 sm:$0xff]  }
 0x225   :  { %2055 = vmatpush1.bf16.msra.mxu0 %v4048_v62  ;;  %2339 = vmatpush1.bf16.msra.mxu1 %v4144_v31  ;;  %v4072_v62 = vld [vmem:[#allocation11 + $0x150] ss:$8 sps:$4 sm:$0xff]  }
 0x226   :  { %2056 = vmatprep.subr.bf16.mxu0 %v4053_v63  ;;  %v4077_v63 = vld [vmem:[#allocation11 + $0x164] ss:$8 sps:$4 sm:$0xff]   ;;  %2340 = vmatprep.subr.bf16.mxu1 %v4149_v19  ;;  %v4230_v19 = vld [vmem:[#allocation15 + $0x94] ss:$8 sps:$4 sm:$0xff]  }
 0x229   :  { %2057 = vmatpush1.bf16.msra.mxu0 %v4051_v0  ;;  %v4075_v0 = vld [vmem:[#allocation11 + $0x160] ss:$8 sps:$4 sm:$0xff]   ;;  %2341 = vmatpush1.bf16.msra.mxu1 %v4147_v20  ;;  %v4228_v20 = vld [vmem:[#allocation15 + $0x90] ss:$8 sps:$4 sm:$0xff]  }
 0x22a   :  { %2058 = vmatprep.subr.bf16.mxu0 %v4056_v1  ;;  %v4080_v1 = vld [vmem:[#allocation11 + $0x174] ss:$8 sps:$4 sm:$0xff]   ;;  %2342 = vmatprep.subr.bf16.mxu1 %v4152_v21  ;;  %v4233_v21 = vld [vmem:[#allocation15 + $0xa4] ss:$8 sps:$4 sm:$0xff]  }
 0x22d   :  { %2059 = vmatpush1.bf16.msra.mxu0 %v4054_v3  ;;  %v4078_v3 = vld [vmem:[#allocation11 + $0x170] ss:$8 sps:$4 sm:$0xff]   ;;  %2343 = vmatpush1.bf16.msra.mxu1 %v4150_v22  ;;  %v4231_v22 = vld [vmem:[#allocation15 + $0xa0] ss:$8 sps:$4 sm:$0xff]  }
 0x22e   :  { %2071 = vmatprep.subr.bf16.mxu0 %v4059_v4  ;;  %v4083_v4 = vld [vmem:[#allocation11 + $0x184] ss:$8 sps:$4 sm:$0xff]   ;;  %2553 = vmatprep.subr.bf16.mxu1 %v4155_v23  ;;  %v4236_v23 = vld [vmem:[#allocation15 + $0xb4] ss:$8 sps:$4 sm:$0xff]  }
 0x2c3   :  { %v1537_v32 = vpop.f32.mrb[4].mxu0  ;;  %v1623_v33 = vpop.f32.mrb[4].mxu1 }
 0x2c4   :  { %v1539_v34 = vpop.f32.mrb[5].mxu0  ;;  %v1625_v35 = vpop.f32.mrb[5].mxu1  ;;  %v1632_v38 = vmax.f32 %v1537_v32, 0.0  ;;  %v1634_v39 = vmax.f32 %v1623_v33, 0.0 }
 0x2c5   :  { %v1541_v36 = vpop.f32.mrb[6].mxu0  ;;  %v1627_v37 = vpop.f32.mrb[6].mxu1  ;;  %v1633_v44 = vmax.f32 %v1539_v34, 0.0  ;;  %v1635_v45 = vmax.f32 %v1625_v35, 0.0  ;;  %v4153_v34 = vld [vmem:[#allocation14] ss:$8 sps:$4 sm:$0xff]  }
 0x2c6   :  { %v1636_v40 = vmax.f32 %v1541_v36, 0.0  ;;  %v1638_v41 = vmax.f32 %v1627_v37, 0.0  ;;  %v1543_v42 = vpop.f32.mrb[7].mxu0  ;;  %v1629_v43 = vpop.f32.mrb[7].mxu1  ;;  %v4158_v35 = vld [vmem:[#allocation14 + $0x14] ss:$8 sps:$4 sm:$0xff]  }
 0x2c7   :  { %v1637_v46 = vmax.f32 %v1543_v42, 0.0  ;;  %v1639_v47 = vmax.f32 %v1629_v43, 0.0  ;;  %v4156_v36 = vld [vmem:[#allocation14 + $0x10] ss:$8 sps:$4 sm:$0xff]   ;;  %v4161_v37 = vld [vmem:[#allocation14 + $0x24] ss:$8 sps:$4 sm:$0xff]  }
 0x2c8   :  { %v1640_v48 = vpack.c.bf16 %v1636_v40, %v1632_v38  ;;  %v4708_v49 = vpack.c.bf16 %v1638_v41, %v1634_v39  ;;  %v4159_v38 = vld [vmem:[#allocation14 + $0x20] ss:$8 sps:$4 sm:$0xff]   ;;  %v4164_v39 = vld [vmem:[#allocation14 + $0x34] ss:$8 sps:$4 sm:$0xff]   ;;  %v4162_v40 = vld [vmem:[#allocation14 + $0x30] ss:$8 sps:$4 sm:$0xff]  }
 0x2c9   :  { %v1641_v50 = vpack.c.bf16 %v1637_v46, %v1633_v44  ;;  %v1643_v51 = vpack.c.bf16 %v1639_v47, %v1635_v45  ;;  %v4167_v41 = vld [vmem:[#allocation14 + $0x44] ss:$8 sps:$4 sm:$0xff]   ;;  %v4165_v42 = vld [vmem:[#allocation14 + $0x40] ss:$8 sps:$4 sm:$0xff]   ;;  %v4170_v43 = vld [vmem:[#allocation14 + $0x54] ss:$8 sps:$4 sm:$0xff]  }
 0x2ca   :  { %v4168_v44 = vld [vmem:[#allocation14 + $0x50] ss:$8 sps:$4 sm:$0xff]   ;;  %v4173_v45 = vld [vmem:[#allocation14 + $0x64] ss:$8 sps:$4 sm:$0xff]   ;;  %v4171_v46 = vld [vmem:[#allocation14 + $0x60] ss:$8 sps:$4 sm:$0xff]  }
 0x2cb   :  { %2060 = vmatprep.mubr.bf16.mxu0 %v1641_v50  ;;  %v4176_v47 = vld [vmem:[#allocation14 + $0x74] ss:$8 sps:$4 sm:$0xff]   ;;  %v4177_v50 = vld [vmem:[#allocation14 + $0x80] ss:$8 sps:$4 sm:$0xff]  }
 0x2cc   :  { %2061 = vmatmul.mubr.bf16.vlgmr.msra.gmra.mrb[8].mxu0 %v1640_v48  ;;  %v4174_v48 = vld [vmem:[#allocation14 + $0x70] ss:$8 sps:$4 sm:$0xff]  }
 0x2cd   :  { %2072 = vmatpush1.bf16.msra.mxu0 %v4057_v52  ;;  %2103 = vmatprep.mubr.bf16.mxu0 %v1643_v51  ;;  %v4182_v51 = vld [vmem:[#allocation14 + $0x94] ss:$8 sps:$4 sm:$0xff]   ;;  %v4180_v52 = vld [vmem:[#allocation14 + $0x90] ss:$8 sps:$4 sm:$0xff]  }
 0x2ce   :  { %2073 = vmatprep.subr.bf16.mxu0 %v4062_v53  ;;  %v4185_v53 = vld [vmem:[#allocation14 + $0xa4] ss:$8 sps:$4 sm:$0xff]  }
 0x2d1   :  { %2074 = vmatpush1.bf16.msra.mxu0 %v4060_v54  ;;  %v4183_v54 = vld [vmem:[#allocation14 + $0xa0] ss:$8 sps:$4 sm:$0xff]  }
 0x2d2   :  { %2075 = vmatprep.subr.bf16.mxu0 %v4065_v55  ;;  %v4188_v55 = vld [vmem:[#allocation14 + $0xb4] ss:$8 sps:$4 sm:$0xff]  }
 0x2d5   :  { %2076 = vmatpush1.bf16.msra.mxu0 %v4063_v56  ;;  %v4186_v56 = vld [vmem:[#allocation14 + $0xb0] ss:$8 sps:$4 sm:$0xff]  }
 0x2d6   :  { %2077 = vmatprep.subr.bf16.mxu0 %v4068_v57  ;;  %v4191_v57 = vld [vmem:[#allocation14 + $0xc4] ss:$8 sps:$4 sm:$0xff]  }
 0x2d9   :  { %2078 = vmatpush1.bf16.msra.mxu0 %v4066_v58  ;;  %v4189_v58 = vld [vmem:[#allocation14 + $0xc0] ss:$8 sps:$4 sm:$0xff]  }
 0x2da   :  { %2079 = vmatprep.subr.bf16.mxu0 %v4071_v59  ;;  %v4194_v59 = vld [vmem:[#allocation14 + $0xd4] ss:$8 sps:$4 sm:$0xff]  }
 0x2dd   :  { %2080 = vmatpush1.bf16.msra.mxu0 %v4069_v60  ;;  %v4192_v60 = vld [vmem:[#allocation14 + $0xd0] ss:$8 sps:$4 sm:$0xff]  }
 0x2de   :  { %2081 = vmatprep.subr.bf16.mxu0 %v4074_v61  ;;  %v4197_v61 = vld [vmem:[#allocation14 + $0xe4] ss:$8 sps:$4 sm:$0xff]  }
 0x2e1   :  { %2082 = vmatpush1.bf16.msra.mxu0 %v4072_v62  ;;  %v4195_v62 = vld [vmem:[#allocation14 + $0xe0] ss:$8 sps:$4 sm:$0xff]  }
 0x2e2   :  { %2083 = vmatprep.subr.bf16.mxu0 %v4077_v63  ;;  %v4200_v63 = vld [vmem:[#allocation14 + $0xf4] ss:$8 sps:$4 sm:$0xff]  }
 0x2e5   :  { %2084 = vmatpush1.bf16.msra.mxu0 %v4075_v0  ;;  %v4198_v0 = vld [vmem:[#allocation14 + $0xf0] ss:$8 sps:$4 sm:$0xff]  }
 0x2e6   :  { %2085 = vmatprep.subr.bf16.mxu0 %v4080_v1  ;;  %v4201_v1 = vld [vmem:[#allocation15] ss:$8 sps:$4 sm:$0xff]  }
 0x2e9   :  { %2086 = vmatpush1.bf16.msra.mxu0 %v4078_v3  ;;  %v4203_v3 = vld [vmem:[#allocation15 + $0x4] ss:$8 sps:$4 sm:$0xff]  }
 0x2ea   :  { %2087 = vmatprep.subr.bf16.mxu0 %v4083_v4  ;;  %v4206_v4 = vld [vmem:[#allocation15 + $0x14] ss:$8 sps:$4 sm:$0xff]  }
 0x2ed   :  { %2088 = vmatpush1.bf16.msra.mxu0 %v4081_v5  ;;  %v4204_v5 = vld [vmem:[#allocation15 + $0x10] ss:$8 sps:$4 sm:$0xff]  }
 0x2ee   :  { %2089 = vmatprep.subr.bf16.mxu0 %v4086_v6  ;;  %v4209_v6 = vld [vmem:[#allocation15 + $0x24] ss:$8 sps:$4 sm:$0xff]  }
 0x2f1   :  { %2090 = vmatpush1.bf16.msra.mxu0 %v4084_v7  ;;  %v4207_v7 = vld [vmem:[#allocation15 + $0x20] ss:$8 sps:$4 sm:$0xff]  }
 0x2f2   :  { %2091 = vmatprep.subr.bf16.mxu0 %v4089_v8  ;;  %v4212_v8 = vld [vmem:[#allocation15 + $0x34] ss:$8 sps:$4 sm:$0xff]  }
 0x2f5   :  { %2092 = vmatpush1.bf16.msra.mxu0 %v4087_v9  ;;  %v4210_v9 = vld [vmem:[#allocation15 + $0x30] ss:$8 sps:$4 sm:$0xff]  }
 0x2f6   :  { %2093 = vmatprep.subr.bf16.mxu0 %v4092_v10  ;;  %v4215_v10 = vld [vmem:[#allocation15 + $0x44] ss:$8 sps:$4 sm:$0xff]  }
 0x2f9   :  { %2094 = vmatpush1.bf16.msra.mxu0 %v4090_v11  ;;  %v4213_v11 = vld [vmem:[#allocation15 + $0x40] ss:$8 sps:$4 sm:$0xff]  }
 0x2fa   :  { %2095 = vmatprep.subr.bf16.mxu0 %v4095_v12  ;;  %v4218_v12 = vld [vmem:[#allocation15 + $0x54] ss:$8 sps:$4 sm:$0xff]  }
 0x2fd   :  { %2096 = vmatpush1.bf16.msra.mxu0 %v4093_v13  ;;  %v4216_v13 = vld [vmem:[#allocation15 + $0x50] ss:$8 sps:$4 sm:$0xff]  }
 0x2fe   :  { %2097 = vmatprep.subr.bf16.mxu0 %v4098_v14  ;;  %v4221_v14 = vld [vmem:[#allocation15 + $0x64] ss:$8 sps:$4 sm:$0xff]  }
 0x301   :  { %2098 = vmatpush1.bf16.msra.mxu0 %v4096_v15  ;;  %v4219_v15 = vld [vmem:[#allocation15 + $0x60] ss:$8 sps:$4 sm:$0xff]  }
 0x302   :  { %2099 = vmatprep.subr.bf16.mxu0 %v4101_v16  ;;  %v4224_v16 = vld [vmem:[#allocation15 + $0x74] ss:$8 sps:$4 sm:$0xff]  }
 0x305   :  { %2100 = vmatpush1.bf16.msra.mxu0 %v4099_v2  ;;  %v4222_v2 = vld [vmem:[#allocation15 + $0x70] ss:$8 sps:$4 sm:$0xff]  }
 0x306   :  { %2101 = vmatprep.subr.bf16.mxu0 %v4104_v17  ;;  %v4227_v17 = vld [vmem:[#allocation15 + $0x84] ss:$8 sps:$4 sm:$0xff]  }
 0x309   :  { %2102 = vmatpush1.bf16.msra.mxu0 %v4102_v18  ;;  %v4225_v18 = vld [vmem:[#allocation15 + $0x80] ss:$8 sps:$4 sm:$0xff]  }
 0x30a   :  { %2794 = vmatprep.subr.bf16.mxu0 %v4203_v3  ;;  %v4282_v3 = vld [vmem:[#allocation17 + $0xb0] ss:$8 sps:$4 sm:$0xff]  }
 0x30c   :  { %2104 = vmatmul.mubr.bf16.vlgmr.msra.gmra.mrb[8].mxu0 %v4708_v49  ;;  %v4179_v49 = vld [vmem:[#allocation14 + $0x84] ss:$8 sps:$4 sm:$0xff]  }
 0x30d   :  { %2795 = vmatpush1.bf16.msra.mxu0 %v4201_v1  ;;  %v4284_v1 = vld [vmem:[#allocation17 + $0xb4] ss:$8 sps:$4 sm:$0xff]  }
 0x30e   :  { %2796 = vmatprep.subr.bf16.mxu0 %v4206_v4  ;;  %v4287_v4 = vld [vmem:[#allocation17 + $0xc4] ss:$8 sps:$4 sm:$0xff]  }
 0x311   :  { %2797 = vmatpush1.bf16.msra.mxu0 %v4204_v5  ;;  %v4285_v5 = vld [vmem:[#allocation17 + $0xc0] ss:$8 sps:$4 sm:$0xff]  }
 0x312   :  { %2798 = vmatprep.subr.bf16.mxu0 %v4209_v6  ;;  %v4290_v6 = vld [vmem:[#allocation17 + $0xd4] ss:$8 sps:$4 sm:$0xff]  }
 0x315   :  { %2799 = vmatpush1.bf16.msra.mxu0 %v4207_v7  ;;  %v4288_v7 = vld [vmem:[#allocation17 + $0xd0] ss:$8 sps:$4 sm:$0xff]  }
 0x316   :  { %2800 = vmatprep.subr.bf16.mxu0 %v4212_v8 }
 0x319   :  { %2801 = vmatpush1.bf16.msra.mxu0 %v4210_v9 }
 0x31a   :  { %2802 = vmatprep.subr.bf16.mxu0 %v4215_v10 }
 0x31d   :  { %2803 = vmatpush1.bf16.msra.mxu0 %v4213_v11 }
 0x31e   :  { %2804 = vmatprep.subr.bf16.mxu0 %v4218_v12 }
 0x321   :  { %2805 = vmatpush1.bf16.msra.mxu0 %v4216_v13 }
 0x322   :  { %2806 = vmatprep.subr.bf16.mxu0 %v4221_v14 }
 0x325   :  { %2807 = vmatpush1.bf16.msra.mxu0 %v4219_v15 }
 0x326   :  { %2808 = vmatprep.subr.bf16.mxu0 %v4224_v16 }
 0x329   :  { %2809 = vmatpush1.bf16.msra.mxu0 %v4222_v2 }
 0x32a   :  { %2810 = vmatprep.subr.bf16.mxu0 %v4227_v17  ;;  %v4293_v17 = vld [vmem:[#allocation17 + $0xe4] ss:$8 sps:$4 sm:$0xff]  }
 0x32d   :  { %2811 = vmatpush1.bf16.msra.mxu0 %v4225_v18  ;;  %v4291_v18 = vld [vmem:[#allocation17 + $0xe0] ss:$8 sps:$4 sm:$0xff]  }
 0x32e   :  { %2812 = vmatprep.subr.bf16.mxu0 %v4230_v19  ;;  %v4296_v19 = vld [vmem:[#allocation17 + $0xf4] ss:$8 sps:$4 sm:$0xff]  }
 0x331   :  { %2813 = vmatpush1.bf16.msra.mxu0 %v4228_v20  ;;  %v4294_v20 = vld [vmem:[#allocation17 + $0xf0] ss:$8 sps:$4 sm:$0xff]  }
 0x332   :  { %2814 = vmatprep.subr.bf16.mxu0 %v4233_v21  ;;  %v4297_v21 = vld [vmem:[#allocation18 + $0x40] sm:$0xff]  }
 0x335   :  { %2815 = vmatpush1.bf16.msra.mxu0 %v4231_v22  ;;  %v4298_v22 = vld [vmem:[#allocation18] sm:$0xff]  }
 0x336   :  { %2816 = vmatprep.subr.bf16.mxu0 %v4236_v23  ;;  %v4299_v23 = vld [vmem:[#allocation18 + $0x48] sm:$0xff]  }
 0x3df   :  { %v2105_v24 = vpop.f32.mrb[8].mxu0 }
 0x3e0   :  { %v2107_v25 = vpop.f32.mrb[9].mxu0  ;;  %v2114_v27 = vmax.f32 %v2105_v24, 0.0  ;;  %v4234_v24 = vld [vmem:[#allocation15 + $0xb0] ss:$8 sps:$4 sm:$0xff]  }
 0x3e1   :  { %v2109_v26 = vpop.f32.mrb[10].mxu0  ;;  %v2115_v30 = vmax.f32 %v2107_v25, 0.0  ;;  %v4239_v25 = vld [vmem:[#allocation15 + $0xc4] ss:$8 sps:$4 sm:$0xff]   ;;  %2817 = vmatpush1.bf16.msra.mxu0 %v4234_v24 }
 0x3e2   :  { %v2116_v28 = vmax.f32 %v2109_v26, 0.0  ;;  %v2111_v29 = vpop.f32.mrb[11].mxu0  ;;  %v4237_v26 = vld [vmem:[#allocation15 + $0xc0] ss:$8 sps:$4 sm:$0xff]   ;;  %2818 = vmatprep.subr.bf16.mxu0 %v4239_v25  ;;  %v4301_v25 = vld [vmem:[#allocation18 + $0x50] sm:$0xff]  }
 0x3e3   :  { %v2117_v31 = vmax.f32 %v2111_v29, 0.0  ;;  %v4300_v24 = vld [vmem:[#allocation18 + $0x8] sm:$0xff]  }
 0x3e4   :  { %v2118_v32 = vpack.c.bf16 %v2116_v28, %v2114_v27  ;;  %v4242_v27 = vld [vmem:[#allocation15 + $0xd4] ss:$8 sps:$4 sm:$0xff]   ;;  %v4240_v28 = vld [vmem:[#allocation15 + $0xd0] ss:$8 sps:$4 sm:$0xff]  }
 0x3e5   :  { %v2119_v33 = vpack.c.bf16 %v2117_v31, %v2115_v30  ;;  %2819 = vmatpush1.bf16.msra.mxu0 %v4237_v26  ;;  %v4302_v26 = vld [vmem:[#allocation18 + $0x10] sm:$0xff]  }
 0x3e6   :  { %2820 = vmatprep.subr.bf16.mxu0 %v4242_v27  ;;  %v4303_v27 = vld [vmem:[#allocation18 + $0x58] sm:$0xff]  }
 0x3e7   :  { %2344 = vmatprep.mubr.bf16.mxu1 %v2119_v33 }
 0x3e8   :  { %2345 = vmatmul.mubr.bf16.vlgmr.msra.gmra.mrb[8].mxu1 %v2118_v32 }
 0x3e9   :  { %2554 = vmatpush1.bf16.msra.mxu1 %v4153_v34  ;;  %2821 = vmatpush1.bf16.msra.mxu0 %v4240_v28  ;;  %v4304_v28 = vld [vmem:[#allocation18 + $0x18] sm:$0xff]  }
 0x3ea   :  { %2555 = vmatprep.subr.bf16.mxu1 %v4158_v35 }
 0x3ed   :  { %2556 = vmatpush1.bf16.msra.mxu1 %v4156_v36 }
 0x3ee   :  { %2557 = vmatprep.subr.bf16.mxu1 %v4161_v37 }
 0x3f1   :  { %2558 = vmatpush1.bf16.msra.mxu1 %v4159_v38 }
 0x3f2   :  { %2559 = vmatprep.subr.bf16.mxu1 %v4164_v39  ;;  %v4245_v39 = vld [vmem:[#allocation15 + $0xe4] ss:$8 sps:$4 sm:$0xff]  }
 0x3f3   :  { %2822 = vmatprep.subr.bf16.mxu0 %v4245_v39 }
 0x3f5   :  { %2560 = vmatpush1.bf16.msra.mxu1 %v4162_v40  ;;  %v4243_v40 = vld [vmem:[#allocation15 + $0xe0] ss:$8 sps:$4 sm:$0xff]  }
 0x3f6   :  { %2561 = vmatprep.subr.bf16.mxu1 %v4167_v41  ;;  %2823 = vmatpush1.bf16.msra.mxu0 %v4243_v40  ;;  %v4248_v41 = vld [vmem:[#allocation15 + $0xf4] ss:$8 sps:$4 sm:$0xff]  }
 0x3f7   :  { %2824 = vmatprep.subr.bf16.mxu0 %v4248_v41 }
 0x3f9   :  { %2562 = vmatpush1.bf16.msra.mxu1 %v4165_v42  ;;  %v4246_v42 = vld [vmem:[#allocation15 + $0xf0] ss:$8 sps:$4 sm:$0xff]  }
 0x3fa   :  { %2563 = vmatprep.subr.bf16.mxu1 %v4170_v43  ;;  %2825 = vmatpush1.bf16.msra.mxu0 %v4246_v42  ;;  %v4249_v43 = vld [vmem:[#allocation17] ss:$8 sps:$4 sm:$0xff]  }
 0x3fb   :  { %3672 = vmatprep.subr.bf16.mxu0 %v4297_v21 }
 0x3fd   :  { %2564 = vmatpush1.bf16.msra.mxu1 %v4168_v44  ;;  %v4251_v44 = vld [vmem:[#allocation17 + $0x4] ss:$8 sps:$4 sm:$0xff]  }
 0x3fe   :  { %2565 = vmatprep.subr.bf16.mxu1 %v4173_v45  ;;  %v4254_v45 = vld [vmem:[#allocation17 + $0x14] ss:$8 sps:$4 sm:$0xff]  }
 0x401   :  { %2566 = vmatpush1.bf16.msra.mxu1 %v4171_v46  ;;  %v4252_v46 = vld [vmem:[#allocation17 + $0x10] ss:$8 sps:$4 sm:$0xff]  }
 0x402   :  { %2567 = vmatprep.subr.bf16.mxu1 %v4176_v47  ;;  %v4257_v47 = vld [vmem:[#allocation17 + $0x24] ss:$8 sps:$4 sm:$0xff]  }
 0x405   :  { %2568 = vmatpush1.bf16.msra.mxu1 %v4174_v48  ;;  %v4255_v48 = vld [vmem:[#allocation17 + $0x20] ss:$8 sps:$4 sm:$0xff]  }
 0x406   :  { %2569 = vmatprep.subr.bf16.mxu1 %v4179_v49  ;;  %v4260_v49 = vld [vmem:[#allocation17 + $0x34] ss:$8 sps:$4 sm:$0xff]  }
 0x409   :  { %2570 = vmatpush1.bf16.msra.mxu1 %v4177_v50  ;;  %v4258_v50 = vld [vmem:[#allocation17 + $0x30] ss:$8 sps:$4 sm:$0xff]  }
 0x40a   :  { %2571 = vmatprep.subr.bf16.mxu1 %v4182_v51  ;;  %v4263_v51 = vld [vmem:[#allocation17 + $0x44] ss:$8 sps:$4 sm:$0xff]  }
 0x40d   :  { %2572 = vmatpush1.bf16.msra.mxu1 %v4180_v52  ;;  %v4261_v52 = vld [vmem:[#allocation17 + $0x40] ss:$8 sps:$4 sm:$0xff]  }
 0x40e   :  { %2573 = vmatprep.subr.bf16.mxu1 %v4185_v53  ;;  %v4266_v53 = vld [vmem:[#allocation17 + $0x54] ss:$8 sps:$4 sm:$0xff]  }
 0x411   :  { %2574 = vmatpush1.bf16.msra.mxu1 %v4183_v54  ;;  %v4264_v54 = vld [vmem:[#allocation17 + $0x50] ss:$8 sps:$4 sm:$0xff]  }
 0x412   :  { %2575 = vmatprep.subr.bf16.mxu1 %v4188_v55  ;;  %v4269_v55 = vld [vmem:[#allocation17 + $0x64] ss:$8 sps:$4 sm:$0xff]  }
 0x415   :  { %2576 = vmatpush1.bf16.msra.mxu1 %v4186_v56  ;;  %v4267_v56 = vld [vmem:[#allocation17 + $0x60] ss:$8 sps:$4 sm:$0xff]  }
 0x416   :  { %2577 = vmatprep.subr.bf16.mxu1 %v4191_v57  ;;  %v4272_v57 = vld [vmem:[#allocation17 + $0x74] ss:$8 sps:$4 sm:$0xff]  }
 0x419   :  { %2578 = vmatpush1.bf16.msra.mxu1 %v4189_v58  ;;  %v4270_v58 = vld [vmem:[#allocation17 + $0x70] ss:$8 sps:$4 sm:$0xff]  }
 0x41a   :  { %2579 = vmatprep.subr.bf16.mxu1 %v4194_v59  ;;  %v4275_v59 = vld [vmem:[#allocation17 + $0x84] ss:$8 sps:$4 sm:$0xff]  }
 0x41d   :  { %2580 = vmatpush1.bf16.msra.mxu1 %v4192_v60  ;;  %v4273_v60 = vld [vmem:[#allocation17 + $0x80] ss:$8 sps:$4 sm:$0xff]  }
 0x41e   :  { %2581 = vmatprep.subr.bf16.mxu1 %v4197_v61  ;;  %v4278_v61 = vld [vmem:[#allocation17 + $0x94] ss:$8 sps:$4 sm:$0xff]  }
 0x421   :  { %2582 = vmatpush1.bf16.msra.mxu1 %v4195_v62  ;;  %v4276_v62 = vld [vmem:[#allocation17 + $0x90] ss:$8 sps:$4 sm:$0xff]  }
 0x422   :  { %2583 = vmatprep.subr.bf16.mxu1 %v4200_v63  ;;  %v4281_v63 = vld [vmem:[#allocation17 + $0xa4] ss:$8 sps:$4 sm:$0xff]  }
 0x425   :  { %2584 = vmatpush1.bf16.msra.mxu1 %v4198_v0  ;;  %v4279_v0 = vld [vmem:[#allocation17 + $0xa0] ss:$8 sps:$4 sm:$0xff]  }
 0x426   :  { %3035 = vmatprep.subr.bf16.mxu1 %v4251_v44  ;;  %v4310_v44 = vld [vmem:[#allocation18 + $0x30] sm:$0xff]  }
 0x4bb   :  { %v2346_v29 = vpop.f32.mrb[8].mxu1 }
 0x4bc   :  { %v2348_v30 = vpop.f32.mrb[9].mxu1  ;;  %v2355_v32 = vmax.f32 %v2346_v29, 0.0  ;;  %v4305_v29 = vld [vmem:[#allocation18 + $0x60] sm:$0xff]  }
 0x4bd   :  { %v2350_v31 = vpop.f32.mrb[10].mxu1  ;;  %v2356_v35 = vmax.f32 %v2348_v30, 0.0  ;;  %v4306_v30 = vld [vmem:[#allocation18 + $0x20] sm:$0xff]  }
 0x4be   :  { %v2357_v33 = vmax.f32 %v2350_v31, 0.0  ;;  %v2352_v34 = vpop.f32.mrb[11].mxu1  ;;  %v4307_v31 = vld [vmem:[#allocation18 + $0x68] sm:$0xff]  }
 0x4bf   :  { %v2358_v36 = vmax.f32 %v2352_v34, 0.0 }
 0x4c0   :  { %v2359_v37 = vpack.c.bf16 %v2357_v33, %v2355_v32  ;;  %v4308_v32 = vld [vmem:[#allocation18 + $0x28] sm:$0xff]  }
 0x4c1   :  { %v2360_v38 = vpack.c.bf16 %v2358_v36, %v2356_v35 }
 0x4c3   :  { %2585 = vmatprep.mubr.bf16.mxu1 %v2360_v38 }
 0x4c4   :  { %2586 = vmatmul.mubr.bf16.vlgmr.msra.gmra.mrb[12].mxu1 %v2359_v37 }
 0x4c5   :  { %3036 = vmatpush1.bf16.msra.mxu1 %v4249_v43  ;;  %v4309_v43 = vld [vmem:[#allocation18 + $0x70] sm:$0xff]  }
 0x4c6   :  { %3037 = vmatprep.subr.bf16.mxu1 %v4254_v45  ;;  %v4311_v45 = vld [vmem:[#allocation18 + $0x78] sm:$0xff]  }
 0x4c9   :  { %3038 = vmatpush1.bf16.msra.mxu1 %v4252_v46  ;;  %v4312_v46 = vld [vmem:[#allocation18 + $0x38] sm:$0xff]  }
 0x4ca   :  { %3039 = vmatprep.subr.bf16.mxu1 %v4257_v47 }
 0x4cd   :  { %3040 = vmatpush1.bf16.msra.mxu1 %v4255_v48 }
 0x4ce   :  { %3041 = vmatprep.subr.bf16.mxu1 %v4260_v49 }
 0x4d1   :  { %3042 = vmatpush1.bf16.msra.mxu1 %v4258_v50 }
 0x4d2   :  { %3043 = vmatprep.subr.bf16.mxu1 %v4263_v51 }
 0x4d5   :  { %3044 = vmatpush1.bf16.msra.mxu1 %v4261_v52 }
 0x4d6   :  { %3045 = vmatprep.subr.bf16.mxu1 %v4266_v53 }
 0x4d9   :  { %3046 = vmatpush1.bf16.msra.mxu1 %v4264_v54 }
 0x4da   :  { %3047 = vmatprep.subr.bf16.mxu1 %v4269_v55 }
 0x4dd   :  { %3048 = vmatpush1.bf16.msra.mxu1 %v4267_v56 }
 0x4de   :  { %3049 = vmatprep.subr.bf16.mxu1 %v4272_v57 }
 0x4e1   :  { %3050 = vmatpush1.bf16.msra.mxu1 %v4270_v58 }
 0x4e2   :  { %3051 = vmatprep.subr.bf16.mxu1 %v4275_v59 }
 0x4e5   :  { %3052 = vmatpush1.bf16.msra.mxu1 %v4273_v60 }
 0x4e6   :  { %3053 = vmatprep.subr.bf16.mxu1 %v4278_v61 }
 0x4e9   :  { %3054 = vmatpush1.bf16.msra.mxu1 %v4276_v62 }
 0x4ea   :  { %3055 = vmatprep.subr.bf16.mxu1 %v4281_v63 }
 0x4ed   :  { %3056 = vmatpush1.bf16.msra.mxu1 %v4279_v0 }
 0x4ee   :  { %3057 = vmatprep.subr.bf16.mxu1 %v4284_v1 }
 0x4f1   :  { %3058 = vmatpush1.bf16.msra.mxu1 %v4282_v3 }
 0x4f2   :  { %3059 = vmatprep.subr.bf16.mxu1 %v4287_v4 }
 0x4f5   :  { %3060 = vmatpush1.bf16.msra.mxu1 %v4285_v5 }
 0x4f6   :  { %3061 = vmatprep.subr.bf16.mxu1 %v4290_v6 }
 0x4f9   :  { %3062 = vmatpush1.bf16.msra.mxu1 %v4288_v7 }
 0x4fa   :  { %3063 = vmatprep.subr.bf16.mxu1 %v4293_v17 }
 0x4fd   :  { %3064 = vmatpush1.bf16.msra.mxu1 %v4291_v18 }
 0x4fe   :  { %3065 = vmatprep.subr.bf16.mxu1 %v4296_v19 }
 0x501   :  { %3066 = vmatpush1.bf16.msra.mxu1 %v4294_v20 }
 0x597   :  { %v2587_v8 = vpop.f32.mrb[12].mxu1 }
 0x598   :  { %v2589_v9 = vpop.f32.mrb[13].mxu1  ;;  %v2596_v11 = vmax.f32 %v2587_v8, 0.0 }
 0x599   :  { %v2591_v10 = vpop.f32.mrb[14].mxu1  ;;  %v2597_v14 = vmax.f32 %v2589_v9, 0.0 }
 0x59a   :  { %v2598_v12 = vmax.f32 %v2591_v10, 0.0  ;;  %v2593_v13 = vpop.f32.mrb[15].mxu1 }
 0x59b   :  { %v2599_v15 = vmax.f32 %v2593_v13, 0.0 }
 0x59c   :  { %v2600_v16 = vpack.c.bf16 %v2598_v12, %v2596_v11 }
 0x59d   :  { %v2601_v2 = vpack.c.bf16 %v2599_v15, %v2597_v14 }
 0x59f   :  { %2826 = vmatprep.mubr.bf16.mxu0 %v2601_v2 }
 0x5a0   :  { %2827 = vmatmul.mubr.bf16.vlgmr.msra.gmra.mrb[12].mxu0 %v2600_v16 }
 0x5a1   :  { %3673 = vmatpush3.bf16.msra.mxu0 %v4298_v22 }
 0x5a2   :  { %3674 = vmatprep.subr.bf16.mxu0 %v4299_v23 }
 0x5a5   :  { %3675 = vmatpush3.bf16.msra.mxu0 %v4300_v24 }
 0x5a6   :  { %3676 = vmatprep.subr.bf16.mxu0 %v4301_v25 }
 0x5a9   :  { %3677 = vmatpush3.bf16.msra.mxu0 %v4302_v26 }
 0x5aa   :  { %3678 = vmatprep.subr.bf16.mxu0 %v4303_v27 }
 0x5ad   :  { %3679 = vmatpush3.bf16.msra.mxu0 %v4304_v28 }
 0x5ae   :  { %3680 = vmatprep.subr.bf16.mxu0 %v4305_v29 }
 0x5b1   :  { %3681 = vmatpush3.bf16.msra.mxu0 %v4306_v30 }
 0x5b2   :  { %3682 = vmatprep.subr.bf16.mxu0 %v4307_v31 }
 0x5b5   :  { %3683 = vmatpush3.bf16.msra.mxu0 %v4308_v32 }
 0x5b6   :  { %3684 = vmatprep.subr.bf16.mxu0 %v4309_v43 }
 0x5b9   :  { %3685 = vmatpush3.bf16.msra.mxu0 %v4310_v44 }
 0x5ba   :  { %3686 = vmatprep.subr.bf16.mxu0 %v4311_v45 }
 0x5bd   :  { %3687 = vmatpush3.bf16.msra.mxu0 %v4312_v46 }
 0x673   :  { %v2828_v33 = vpop.f32.mrb[12].mxu0 }
 0x674   :  { %v2830_v34 = vpop.f32.mrb[13].mxu0  ;;  %v2837_v36 = vmax.f32 %v2828_v33, 0.0 }
 0x675   :  { %v2832_v35 = vpop.f32.mrb[14].mxu0  ;;  %v2838_v39 = vmax.f32 %v2830_v34, 0.0 }
 0x676   :  { %v2839_v37 = vmax.f32 %v2832_v35, 0.0  ;;  %v2834_v38 = vpop.f32.mrb[15].mxu0 }
 0x677   :  { %v2840_v40 = vmax.f32 %v2834_v38, 0.0 }
 0x678   :  { %v2841_v41 = vpack.c.bf16 %v2839_v37, %v2837_v36 }
 0x679   :  { %v2842_v42 = vpack.c.bf16 %v2840_v40, %v2838_v39 }
 0x67b   :  { %3067 = vmatprep.mubr.bf16.mxu1 %v2842_v42 }
 0x67c   :  { %3068 = vmatmul.mubr.bf16.vlgmr.msra.gmra.mrb[16].mxu1 %v2841_v41 }
 0x74f   :  { %v3069_v47 = vpop.f32.mrb[16].mxu1 }
 0x750   :  { %v3071_v48 = vpop.f32.mrb[17].mxu1  ;;  %v3078_v50 = vmax.f32 %v3069_v47, 0.0 }
 0x751   :  { %v3073_v49 = vpop.f32.mrb[18].mxu1  ;;  %v3079_v53 = vmax.f32 %v3071_v48, 0.0 }
 0x752   :  { %v3080_v51 = vmax.f32 %v3073_v49, 0.0  ;;  %v3075_v52 = vpop.f32.mrb[19].mxu1 }
 0x753   :  { %v3081_v54 = vmax.f32 %v3075_v52, 0.0 }
 0x754   :  { %v3082_v55 = vpack.c.bf16 %v3080_v51, %v3078_v50 }
 0x755   :  { %v3083_v56 = vpack.c.bf16 %v3081_v54, %v3079_v53 }
 0x757   :  { %3244 = vmatprep.mubr.bf16.mxu0 %v3083_v56 }
 0x758   :  { %3245 = vmatmul.mubr.bf16.vlgmr.msra.gmra.mrb[16].mxu0 %v3082_v55 }
 0x82b   :  { %v3688_v57 = vpop.f32.mrb[16].mxu0 }
 0x82c   :  { %v3689_v58 = vpop.f32.mrb[17].mxu0 }
 0x82d   :  { %v3690_v59 = vadd.f32 %v3689_v58, %v3688_v57  ;;  %v3691_v60 = vpop.f32.mrb[18].mxu0 }
 0x82e   :  { %v3692_v61 = vpop.f32.mrb[19].mxu0 }
 0x82f   :  { %3253 = vst [vmem:[%s4727_s10] sm:$0xff] %v3690_v59  ;;  %v3693_v62 = vadd.f32 %v3692_v61, %v3691_v60 }
 0x831   :  { %3254 = vst [vmem:[%s4727_s10 + $0x8] sm:$0xff] %v3693_v62 }
 0x832   :  { %3259 = vsyncpa [#allocation8], 1 }
 0x833   :  { %3260 = vsyncpa [#allocation10], 1 }
 0x834   :  { %3261 = vsyncpa [#allocation13], 1 }
 0x835   :  { %3262 = vsyncpa [#allocation16], 1 }
 0x836   :  { %3263 = vsyncpa [#allocation19], 1 }

</bundles_post_ra>
